<compile_context>
chip_gen: v7x
topology: tpu7x:2x2x1
jax: 0.10.0
libtpu: 0.0.40
codegen_flags: <defaults>
</compile_context>

<pallas_src>
import functools

import jax
import jax.numpy as jnp
from jax.experimental import pallas as pl
from jax.experimental.pallas import tpu as pltpu  # noqa: F401  (TPU backend)

CFG = dict(vocab=64, hidden=32, layers=2, heads=4, head_dim=8, inter=64,
           max_pos=16, type_vocab=2, seq=8, batch=2)

N_LABELS = 14     # 13 heads x 4 classes + 1 head x 2 classes
N_CLASSES = 4     # per-head class slots (last head padded with -1e30 bias)
OUT_PAD = 16      # lane-pad the int32 prediction output


# --------------------------------------------------------------------------
# In-kernel helpers (traced inside the fused kernel)
# --------------------------------------------------------------------------
def _gelu(y):
    # TODO(synk): HF BERT uses exact erf-GELU; tanh approximation used here.
    c = 0.7978845608028654
    return 0.5 * y * (1.0 + jnp.tanh(c * (y + 0.044715 * y * y * y)))


def _ln(x, g, b):
    mu = jnp.mean(x, axis=-1, keepdims=True)
    xc = x - mu
    var = jnp.mean(xc * xc, axis=-1, keepdims=True)
    return xc * jax.lax.rsqrt(var + 1e-12) * g + b


def _dot_bf16(a, w):
    # bf16 MXU operands, f32 accumulation (valid on v5e/v6e/v7x MXUs).
    return jnp.dot(a.astype(jnp.bfloat16), w.astype(jnp.bfloat16),
                   preferred_element_type=jnp.float32)


# --------------------------------------------------------------------------
# Single fused Pallas kernel: embeddings -> L encoder layers -> heads -> argmax
# --------------------------------------------------------------------------
def _chexbert_kernel(ids_ref, wemb_ref, pemb_ref, temb_ref, eg_ref, eb_ref,
                     wqkv_ref, bqkv_ref, wo_ref, bo_ref, ln1g_ref, ln1b_ref,
                     w1_ref, b1_ref, w2_ref, b2_ref, ln2g_ref, ln2b_ref,
                     hw_ref, hb_ref, out_ref, *, B, S, H, nH, dh, L):
    M = B * S
    V = wemb_ref.shape[0]

    # ---- embeddings: one-hot matmul (== exact gather) + pos + token-type-0 ----
    ids = ids_ref[...]                                               # (M, 1) int32
    onehot = (jax.lax.broadcasted_iota(jnp.int32, (M, V), 1) == ids)
    x = jnp.dot(onehot.astype(jnp.float32), wemb_ref[...],
                preferred_element_type=jnp.float32)                  # (M, H)
    pos = pemb_ref[...][:S, :]                                       # (S, H)
    x = x + jnp.concatenate([pos] * B, axis=0) + temb_ref[...][0:1, :]
    x = _ln(x, eg_ref[...], eb_ref[...])

    scale = 1.0 / (dh ** 0.5)
    for l in range(L):                                               # static unroll
        # fused QKV projection: one lane-dense MXU pass, N = 3H
        qkv = _dot_bf16(x, wqkv_ref[l]) + bqkv_ref[l]                # (M, 3H)
        q, k, v = qkv[:, :H], qkv[:, H:2 * H], qkv[:, 2 * H:]

        # per-head batched attention, all inside the kernel (no grid, no k.T)
        ctx_heads = []
        for h in range(nH):                                          # static unroll
            sl = slice(h * dh, (h + 1) * dh)
            qh = q[:, sl].reshape(B, S, dh)
            kh = k[:, sl].reshape(B, S, dh)
            vh = v[:, sl].reshape(B, S, dh)
            s = jnp.einsum("bqd,bkd->bqk", qh, kh,
                           preferred_element_type=jnp.float32) * scale
            m = jnp.max(s, axis=-1, keepdims=True)
            p = jnp.exp(s - m)
            p = p * pl.reciprocal(jnp.sum(p, axis=-1, keepdims=True), approx=True)
            ch = jnp.einsum("bqk,bkd->bqd", p, vh,
                            preferred_element_type=jnp.float32)
            ctx_heads.append(ch.reshape(M, dh))
        ctx = jnp.concatenate(ctx_heads, axis=1)                     # (M, H)

        x = _ln(_dot_bf16(ctx, wo_ref[l]) + bo_ref[l] + x, ln1g_ref[l], ln1b_ref[l])
        f = _gelu(_dot_bf16(x, w1_ref[l]) + b1_ref[l])
        f = _dot_bf16(f, w2_ref[l]) + b2_ref[l]
        x = _ln(f + x, ln2g_ref[l], ln2b_ref[l])

    # ---- CLS rows -> 14 linear heads -> argmax (class-major packed logits) ----
    # Dropout(p=0.1) on CLS is identity in eval mode.
    cls = jnp.concatenate([x[b * S:b * S + 1, :] for b in range(B)], axis=0)  # (B, H)
    logits = jnp.dot(cls, hw_ref[...],
                     preferred_element_type=jnp.float32) + hb_ref[...]        # (B, 56)
    # column layout: c * N_LABELS + head  ->  (head, class c)
    l0 = logits[:, 0 * N_LABELS:1 * N_LABELS]
    l1 = logits[:, 1 * N_LABELS:2 * N_LABELS]
    l2 = logits[:, 2 * N_LABELS:3 * N_LABELS]
    l3 = logits[:, 3 * N_LABELS:4 * N_LABELS]
    m = jnp.maximum(jnp.maximum(l0, l1), jnp.maximum(l2, l3))
    preds = jnp.where(l0 == m, 0,
            jnp.where(l1 == m, 1,
            jnp.where(l2 == m, 2, 3))).astype(jnp.int32)   # first-max tie-break (torch.argmax)
    out_ref[...] = jnp.concatenate(
        [preds, jnp.zeros((B, OUT_PAD - N_LABELS), jnp.int32)], axis=1)


# --------------------------------------------------------------------------
# Parameter construction (deterministic, synthetic)
# --------------------------------------------------------------------------
def init_params(key, cfg):
    H, I, L = cfg["hidden"], cfg["inter"], cfg["layers"]
    keys = iter(jax.random.split(key, 256))
    nrm = lambda shape: 0.02 * jax.random.normal(next(keys), shape, jnp.float32)

    p = {
        "word_emb": nrm((cfg["vocab"], H)),
        "pos_emb": nrm((cfg["max_pos"], H)),
        "type_emb": nrm((cfg["type_vocab"], H)),
        "emb_ln_g": jnp.ones((1, H), jnp.float32),
        "emb_ln_b": jnp.zeros((1, H), jnp.float32),
    }

    layers = []
    for _ in range(L):
        wq, wk, wv = nrm((H, H)), nrm((H, H)), nrm((H, H))
        layers.append(dict(
            wqkv=jnp.concatenate([wq, wk, wv], axis=1),          # (H, 3H) fused QKV
            bqkv=jnp.zeros((1, 3 * H), jnp.float32),
            wo=nrm((H, H)), bo=jnp.zeros((1, H), jnp.float32),
            ln1_g=jnp.ones((1, H), jnp.float32), ln1_b=jnp.zeros((1, H), jnp.float32),
            w1=nrm((H, I)), b1=jnp.zeros((1, I), jnp.float32),
            w2=nrm((I, H)), b2=jnp.zeros((1, H), jnp.float32),
            ln2_g=jnp.ones((1, H), jnp.float32), ln2_b=jnp.zeros((1, H), jnp.float32),
        ))
    for name in layers[0]:                                       # stack along L axis
        p[name] = jnp.stack([lyr[name] for lyr in layers], axis=0)

    # 13 heads with 4 classes + 1 head with 2 classes (padded with -1e30 bias),
    # packed CLASS-MAJOR: column c * 14 + h  ->  (head h, class c).
    W, Bv = [], []
    for _ in range(13):
        W.append(nrm((H, 4)))
        Bv.append(jnp.zeros((4,), jnp.float32))
    w14 = nrm((H, 2))
    W.append(jnp.concatenate([w14, jnp.zeros((H, 2), jnp.float32)], axis=1))
    Bv.append(jnp.array([0.0, 0.0, -1e30, -1e30], jnp.float32))
    Ws = jnp.stack(W, axis=0)                                    # (14, H, 4)
    Bs = jnp.stack(Bv, axis=0)                                   # (14, 4)
    p["heads_w"] = Ws.transpose(1, 2, 0).reshape(H, N_CLASSES * N_LABELS)
    p["heads_b"] = Bs.T.reshape(1, N_CLASSES * N_LABELS)
    return p


# --------------------------------------------------------------------------
# Forward: one pallas_call (everything VMEM-resident), tiny slice in the wrapper
# --------------------------------------------------------------------------
@jax.jit
def chexbert_forward(params, input_ids):
    B, S = input_ids.shape
    ids = input_ids.reshape(B * S, 1).astype(jnp.int32)
    kernel = functools.partial(
        _chexbert_kernel, B=B, S=S, H=CFG["hidden"], nH=CFG["heads"],
        dh=CFG["head_dim"], L=CFG["layers"])
    out = pl.pallas_call(
        kernel,
        out_shape=jax.ShapeDtypeStruct((B, OUT_PAD), jnp.int32),
    )(ids,
      params["word_emb"], params["pos_emb"], params["type_emb"],
      params["emb_ln_g"], params["emb_ln_b"],
      params["wqkv"], params["bqkv"], params["wo"], params["bo"],
      params["ln1_g"], params["ln1_b"],
      params["w1"], params["b1"], params["w2"], params["b2"],
      params["ln2_g"], params["ln2_b"],
      params["heads_w"], params["heads_b"])
    return out[:, :N_LABELS]                                     # (B, 14) int32


# --------------------------------------------------------------------------
if __name__ == "__main__":
    key = jax.random.PRNGKey(0)
    k_params, k_ids = jax.random.split(key)
    params = init_params(k_params, CFG)
    input_ids = jax.random.randint(k_ids, (CFG["batch"], CFG["seq"]), 0, CFG["vocab"],
                                   dtype=jnp.int32)
    preds = chexbert_forward(params, input_ids)
    jax.block_until_ready(preds)
    assert preds.shape == (CFG["batch"], N_LABELS) and preds.dtype == jnp.int32
    assert bool(jnp.all((preds >= 0) & (preds < N_CLASSES)))
    print("KERNEL_OK")
</pallas_src>

<mosaic_0001>
module attributes {stable_mosaic.version = 11 : i64} {
  func.func @_chexbert_kernel(%arg0: memref<16x1xi32, #tpu.memory_space<vmem>>, %arg1: memref<64x32xf32, #tpu.memory_space<vmem>>, %arg2: memref<16x32xf32, #tpu.memory_space<vmem>>, %arg3: memref<2x32xf32, #tpu.memory_space<vmem>>, %arg4: memref<1x32xf32, #tpu.memory_space<vmem>>, %arg5: memref<1x32xf32, #tpu.memory_space<vmem>>, %arg6: memref<2x32x96xf32, #tpu.memory_space<vmem>>, %arg7: memref<2x1x96xf32, #tpu.memory_space<vmem>>, %arg8: memref<2x32x32xf32, #tpu.memory_space<vmem>>, %arg9: memref<2x1x32xf32, #tpu.memory_space<vmem>>, %arg10: memref<2x1x32xf32, #tpu.memory_space<vmem>>, %arg11: memref<2x1x32xf32, #tpu.memory_space<vmem>>, %arg12: memref<2x32x64xf32, #tpu.memory_space<vmem>>, %arg13: memref<2x1x64xf32, #tpu.memory_space<vmem>>, %arg14: memref<2x64x32xf32, #tpu.memory_space<vmem>>, %arg15: memref<2x1x32xf32, #tpu.memory_space<vmem>>, %arg16: memref<2x1x32xf32, #tpu.memory_space<vmem>>, %arg17: memref<2x1x32xf32, #tpu.memory_space<vmem>>, %arg18: memref<32x56xf32, #tpu.memory_space<vmem>>, %arg19: memref<1x56xf32, #tpu.memory_space<vmem>>, %arg20: memref<2x16xi32, #tpu.memory_space<vmem>>) attributes {dimension_semantics = [], scalar_prefetch = 0 : i64, scratch_operands = 0 : i64, tpu.core_type = #tpu.core_type<tc>} {
    %c0 = arith.constant 0 : index
    %c0_0 = arith.constant 0 : index
    %0 = vector.load %arg0[%c0, %c0_0] : memref<16x1xi32, #tpu.memory_space<vmem>>, vector<16x1xi32>
    %1 = tpu.iota {dimensions = array<i32: 1>} : vector<16x64xi32>
    %2 = vector.broadcast %0 : vector<16x1xi32> to vector<16x64xi32>
    %3 = arith.cmpi eq, %1, %2 : vector<16x64xi32>
    %4 = arith.extui %3 : vector<16x64xi1> to vector<16x64xi32>
    %5 = arith.sitofp %4 : vector<16x64xi32> to vector<16x64xf32>
    %c0_1 = arith.constant 0 : index
    %c0_2 = arith.constant 0 : index
    %6 = vector.load %arg1[%c0_1, %c0_2] : memref<64x32xf32, #tpu.memory_space<vmem>>, vector<64x32xf32>
    %cst = arith.constant dense<0.000000e+00> : vector<16x32xf32>
    %7 = tpu.matmul %5, %6, %cst {dimension_numbers = #tpu.dot_dimension_numbers<[1], [0], [0], [1], [0, 0, 1, 1], [], []>} : vector<16x64xf32>, vector<64x32xf32>, vector<16x32xf32> -> vector<16x32xf32>
    %c0_3 = arith.constant 0 : index
    %c0_4 = arith.constant 0 : index
    %8 = vector.load %arg2[%c0_3, %c0_4] : memref<16x32xf32, #tpu.memory_space<vmem>>, vector<16x32xf32>
    %9 = vector.extract_strided_slice %8 {offsets = [0, 0], sizes = [8, 32], strides = [1, 1]} : vector<16x32xf32> to vector<8x32xf32>
    %10 = tpu.concatenate %9, %9 in 0 : vector<8x32xf32>, vector<8x32xf32> -> vector<16x32xf32>
    %11 = arith.addf %7, %10 : vector<16x32xf32>
    %c0_5 = arith.constant 0 : index
    %c0_6 = arith.constant 0 : index
    %12 = vector.load %arg3[%c0_5, %c0_6] : memref<2x32xf32, #tpu.memory_space<vmem>>, vector<2x32xf32>
    %13 = vector.extract_strided_slice %12 {offsets = [0, 0], sizes = [1, 32], strides = [1, 1]} : vector<2x32xf32> to vector<1x32xf32>
    %14 = vector.broadcast %13 : vector<1x32xf32> to vector<16x32xf32>
    %15 = arith.addf %11, %14 : vector<16x32xf32>
    %c0_7 = arith.constant 0 : index
    %c0_8 = arith.constant 0 : index
    %16 = vector.load %arg4[%c0_7, %c0_8] : memref<1x32xf32, #tpu.memory_space<vmem>>, vector<1x32xf32>
    %c0_9 = arith.constant 0 : index
    %c0_10 = arith.constant 0 : index
    %17 = vector.load %arg5[%c0_9, %c0_10] : memref<1x32xf32, #tpu.memory_space<vmem>>, vector<1x32xf32>
    %cst_11 = arith.constant dense<0.000000e+00> : vector<16xf32>
    %18 = vector.multi_reduction <add>, %15, %cst_11 [1] : vector<16x32xf32> to vector<16xf32>
    %19 = vector.shape_cast %18 : vector<16xf32> to vector<16x1xf32>
    %cst_12 = arith.constant 3.200000e+01 : f32
    %20 = vector.broadcast %cst_12 : f32 to vector<16x1xf32>
    %21 = arith.divf %19, %20 : vector<16x1xf32>
    %22 = vector.broadcast %21 : vector<16x1xf32> to vector<16x32xf32>
    %23 = arith.subf %15, %22 : vector<16x32xf32>
    %24 = arith.mulf %23, %23 : vector<16x32xf32>
    %cst_13 = arith.constant dense<0.000000e+00> : vector<16xf32>
    %25 = vector.multi_reduction <add>, %24, %cst_13 [1] : vector<16x32xf32> to vector<16xf32>
    %26 = vector.shape_cast %25 : vector<16xf32> to vector<16x1xf32>
    %cst_14 = arith.constant 3.200000e+01 : f32
    %27 = vector.broadcast %cst_14 : f32 to vector<16x1xf32>
    %28 = arith.divf %26, %27 : vector<16x1xf32>
    %cst_15 = arith.constant 9.99999996E-13 : f32
    %29 = vector.broadcast %cst_15 : f32 to vector<16x1xf32>
    %30 = arith.addf %28, %29 : vector<16x1xf32>
    %31 = math.rsqrt %30 : vector<16x1xf32>
    %32 = vector.broadcast %31 : vector<16x1xf32> to vector<16x32xf32>
    %33 = arith.mulf %23, %32 : vector<16x32xf32>
    %34 = vector.broadcast %16 : vector<1x32xf32> to vector<16x32xf32>
    %35 = arith.mulf %33, %34 : vector<16x32xf32>
    %36 = vector.broadcast %17 : vector<1x32xf32> to vector<16x32xf32>
    %37 = arith.addf %35, %36 : vector<16x32xf32>
    %c0_16 = arith.constant 0 : index
    %c0_17 = arith.constant 0 : index
    %c0_18 = arith.constant 0 : index
    %38 = vector.load %arg6[%c0_16, %c0_17, %c0_18] : memref<2x32x96xf32, #tpu.memory_space<vmem>>, vector<1x32x96xf32>
    %39 = vector.shape_cast %38 : vector<1x32x96xf32> to vector<32x96xf32>
    %40 = arith.truncf %37 : vector<16x32xf32> to vector<16x32xbf16>
    %41 = arith.truncf %39 : vector<32x96xf32> to vector<32x96xbf16>
    %cst_19 = arith.constant dense<0.000000e+00> : vector<16x96xf32>
    %42 = tpu.matmul %40, %41, %cst_19 {dimension_numbers = #tpu.dot_dimension_numbers<[1], [0], [0], [1], [0, 0, 1, 1], [], []>} : vector<16x32xbf16>, vector<32x96xbf16>, vector<16x96xf32> -> vector<16x96xf32>
    %c0_20 = arith.constant 0 : index
    %c0_21 = arith.constant 0 : index
    %c0_22 = arith.constant 0 : index
    %43 = vector.load %arg7[%c0_20, %c0_21, %c0_22] : memref<2x1x96xf32, #tpu.memory_space<vmem>>, vector<1x1x96xf32>
    %44 = vector.shape_cast %43 : vector<1x1x96xf32> to vector<1x96xf32>
    %45 = vector.broadcast %44 : vector<1x96xf32> to vector<16x96xf32>
    %46 = arith.addf %42, %45 : vector<16x96xf32>
    %47 = vector.extract_strided_slice %46 {offsets = [0, 0], sizes = [16, 32], strides = [1, 1]} : vector<16x96xf32> to vector<16x32xf32>
    %48 = vector.extract_strided_slice %46 {offsets = [0, 32], sizes = [16, 32], strides = [1, 1]} : vector<16x96xf32> to vector<16x32xf32>
    %49 = vector.extract_strided_slice %46 {offsets = [0, 64], sizes = [16, 32], strides = [1, 1]} : vector<16x96xf32> to vector<16x32xf32>
    %50 = vector.extract_strided_slice %47 {offsets = [0, 0], sizes = [16, 8], strides = [1, 1]} : vector<16x32xf32> to vector<16x8xf32>
    %51 = vector.shape_cast %50 : vector<16x8xf32> to vector<2x8x8xf32>
    %52 = vector.extract_strided_slice %48 {offsets = [0, 0], sizes = [16, 8], strides = [1, 1]} : vector<16x32xf32> to vector<16x8xf32>
    %53 = vector.shape_cast %52 : vector<16x8xf32> to vector<2x8x8xf32>
    %54 = vector.extract_strided_slice %49 {offsets = [0, 0], sizes = [16, 8], strides = [1, 1]} : vector<16x32xf32> to vector<16x8xf32>
    %55 = vector.shape_cast %54 : vector<16x8xf32> to vector<2x8x8xf32>
    "tpu.trace_start"() <{level = 10 : i32, message = "bqd,bkd->bqk"}> : () -> ()
    %cst_23 = arith.constant dense<0.000000e+00> : vector<2x8x8xf32>
    %56 = tpu.matmul %51, %53, %cst_23 {dimension_numbers = #tpu.dot_dimension_numbers<[2], [2], [1], [1], [0, 0, 0, 1, 1, 1], [0], [0]>} : vector<2x8x8xf32>, vector<2x8x8xf32>, vector<2x8x8xf32> -> vector<2x8x8xf32>
    "tpu.trace_stop"() : () -> ()
    %cst_24 = arith.constant 0.353553385 : f32
    %57 = vector.broadcast %cst_24 : f32 to vector<2x8x8xf32>
    %58 = arith.mulf %56, %57 : vector<2x8x8xf32>
    %cst_25 = arith.constant dense<0xFF800000> : vector<2x8xf32>
    %59 = vector.multi_reduction <maximumf>, %58, %cst_25 [2] : vector<2x8x8xf32> to vector<2x8xf32>
    %60 = vector.shape_cast %59 : vector<2x8xf32> to vector<2x8x1xf32>
    %61 = vector.broadcast %60 : vector<2x8x1xf32> to vector<2x8x8xf32>
    %62 = arith.subf %58, %61 : vector<2x8x8xf32>
    %63 = math.exp %62 : vector<2x8x8xf32>
    %cst_26 = arith.constant dense<0.000000e+00> : vector<2x8xf32>
    %64 = vector.multi_reduction <add>, %63, %cst_26 [2] : vector<2x8x8xf32> to vector<2x8xf32>
    %65 = vector.shape_cast %64 : vector<2x8xf32> to vector<2x8x1xf32>
    %66 = tpu.reciprocal %65 {approx = true} : vector<2x8x1xf32> -> vector<2x8x1xf32>
    %67 = vector.broadcast %66 : vector<2x8x1xf32> to vector<2x8x8xf32>
    %68 = arith.mulf %63, %67 : vector<2x8x8xf32>
    "tpu.trace_start"() <{level = 10 : i32, message = "bqk,bkd->bqd"}> : () -> ()
    %cst_27 = arith.constant dense<0.000000e+00> : vector<2x8x8xf32>
    %69 = tpu.matmul %68, %55, %cst_27 {dimension_numbers = #tpu.dot_dimension_numbers<[2], [1], [1], [2], [0, 0, 0, 1, 1, 2], [0], [0]>} : vector<2x8x8xf32>, vector<2x8x8xf32>, vector<2x8x8xf32> -> vector<2x8x8xf32>
    "tpu.trace_stop"() : () -> ()
    %70 = vector.shape_cast %69 : vector<2x8x8xf32> to vector<16x8xf32>
    %71 = vector.extract_strided_slice %47 {offsets = [0, 8], sizes = [16, 8], strides = [1, 1]} : vector<16x32xf32> to vector<16x8xf32>
    %72 = vector.shape_cast %71 : vector<16x8xf32> to vector<2x8x8xf32>
    %73 = vector.extract_strided_slice %48 {offsets = [0, 8], sizes = [16, 8], strides = [1, 1]} : vector<16x32xf32> to vector<16x8xf32>
    %74 = vector.shape_cast %73 : vector<16x8xf32> to vector<2x8x8xf32>
    %75 = vector.extract_strided_slice %49 {offsets = [0, 8], sizes = [16, 8], strides = [1, 1]} : vector<16x32xf32> to vector<16x8xf32>
    %76 = vector.shape_cast %75 : vector<16x8xf32> to vector<2x8x8xf32>
    "tpu.trace_start"() <{level = 10 : i32, message = "bqd,bkd->bqk"}> : () -> ()
    %cst_28 = arith.constant dense<0.000000e+00> : vector<2x8x8xf32>
    %77 = tpu.matmul %72, %74, %cst_28 {dimension_numbers = #tpu.dot_dimension_numbers<[2], [2], [1], [1], [0, 0, 0, 1, 1, 1], [0], [0]>} : vector<2x8x8xf32>, vector<2x8x8xf32>, vector<2x8x8xf32> -> vector<2x8x8xf32>
    "tpu.trace_stop"() : () -> ()
    %cst_29 = arith.constant 0.353553385 : f32
    %78 = vector.broadcast %cst_29 : f32 to vector<2x8x8xf32>
    %79 = arith.mulf %77, %78 : vector<2x8x8xf32>
    %cst_30 = arith.constant dense<0xFF800000> : vector<2x8xf32>
    %80 = vector.multi_reduction <maximumf>, %79, %cst_30 [2] : vector<2x8x8xf32> to vector<2x8xf32>
    %81 = vector.shape_cast %80 : vector<2x8xf32> to vector<2x8x1xf32>
    %82 = vector.broadcast %81 : vector<2x8x1xf32> to vector<2x8x8xf32>
    %83 = arith.subf %79, %82 : vector<2x8x8xf32>
    %84 = math.exp %83 : vector<2x8x8xf32>
    %cst_31 = arith.constant dense<0.000000e+00> : vector<2x8xf32>
    %85 = vector.multi_reduction <add>, %84, %cst_31 [2] : vector<2x8x8xf32> to vector<2x8xf32>
    %86 = vector.shape_cast %85 : vector<2x8xf32> to vector<2x8x1xf32>
    %87 = tpu.reciprocal %86 {approx = true} : vector<2x8x1xf32> -> vector<2x8x1xf32>
    %88 = vector.broadcast %87 : vector<2x8x1xf32> to vector<2x8x8xf32>
    %89 = arith.mulf %84, %88 : vector<2x8x8xf32>
    "tpu.trace_start"() <{level = 10 : i32, message = "bqk,bkd->bqd"}> : () -> ()
    %cst_32 = arith.constant dense<0.000000e+00> : vector<2x8x8xf32>
    %90 = tpu.matmul %89, %76, %cst_32 {dimension_numbers = #tpu.dot_dimension_numbers<[2], [1], [1], [2], [0, 0, 0, 1, 1, 2], [0], [0]>} : vector<2x8x8xf32>, vector<2x8x8xf32>, vector<2x8x8xf32> -> vector<2x8x8xf32>
    "tpu.trace_stop"() : () -> ()
    %91 = vector.shape_cast %90 : vector<2x8x8xf32> to vector<16x8xf32>
    %92 = vector.extract_strided_slice %47 {offsets = [0, 16], sizes = [16, 8], strides = [1, 1]} : vector<16x32xf32> to vector<16x8xf32>
    %93 = vector.shape_cast %92 : vector<16x8xf32> to vector<2x8x8xf32>
    %94 = vector.extract_strided_slice %48 {offsets = [0, 16], sizes = [16, 8], strides = [1, 1]} : vector<16x32xf32> to vector<16x8xf32>
    %95 = vector.shape_cast %94 : vector<16x8xf32> to vector<2x8x8xf32>
    %96 = vector.extract_strided_slice %49 {offsets = [0, 16], sizes = [16, 8], strides = [1, 1]} : vector<16x32xf32> to vector<16x8xf32>
    %97 = vector.shape_cast %96 : vector<16x8xf32> to vector<2x8x8xf32>
    "tpu.trace_start"() <{level = 10 : i32, message = "bqd,bkd->bqk"}> : () -> ()
    %cst_33 = arith.constant dense<0.000000e+00> : vector<2x8x8xf32>
    %98 = tpu.matmul %93, %95, %cst_33 {dimension_numbers = #tpu.dot_dimension_numbers<[2], [2], [1], [1], [0, 0, 0, 1, 1, 1], [0], [0]>} : vector<2x8x8xf32>, vector<2x8x8xf32>, vector<2x8x8xf32> -> vector<2x8x8xf32>
    "tpu.trace_stop"() : () -> ()
    %cst_34 = arith.constant 0.353553385 : f32
    %99 = vector.broadcast %cst_34 : f32 to vector<2x8x8xf32>
    %100 = arith.mulf %98, %99 : vector<2x8x8xf32>
    %cst_35 = arith.constant dense<0xFF800000> : vector<2x8xf32>
    %101 = vector.multi_reduction <maximumf>, %100, %cst_35 [2] : vector<2x8x8xf32> to vector<2x8xf32>
    %102 = vector.shape_cast %101 : vector<2x8xf32> to vector<2x8x1xf32>
    %103 = vector.broadcast %102 : vector<2x8x1xf32> to vector<2x8x8xf32>
    %104 = arith.subf %100, %103 : vector<2x8x8xf32>
    %105 = math.exp %104 : vector<2x8x8xf32>
    %cst_36 = arith.constant dense<0.000000e+00> : vector<2x8xf32>
    %106 = vector.multi_reduction <add>, %105, %cst_36 [2] : vector<2x8x8xf32> to vector<2x8xf32>
    %107 = vector.shape_cast %106 : vector<2x8xf32> to vector<2x8x1xf32>
    %108 = tpu.reciprocal %107 {approx = true} : vector<2x8x1xf32> -> vector<2x8x1xf32>
    %109 = vector.broadcast %108 : vector<2x8x1xf32> to vector<2x8x8xf32>
    %110 = arith.mulf %105, %109 : vector<2x8x8xf32>
    "tpu.trace_start"() <{level = 10 : i32, message = "bqk,bkd->bqd"}> : () -> ()
    %cst_37 = arith.constant dense<0.000000e+00> : vector<2x8x8xf32>
    %111 = tpu.matmul %110, %97, %cst_37 {dimension_numbers = #tpu.dot_dimension_numbers<[2], [1], [1], [2], [0, 0, 0, 1, 1, 2], [0], [0]>} : vector<2x8x8xf32>, vector<2x8x8xf32>, vector<2x8x8xf32> -> vector<2x8x8xf32>
    "tpu.trace_stop"() : () -> ()
    %112 = vector.shape_cast %111 : vector<2x8x8xf32> to vector<16x8xf32>
    %113 = vector.extract_strided_slice %47 {offsets = [0, 24], sizes = [16, 8], strides = [1, 1]} : vector<16x32xf32> to vector<16x8xf32>
    %114 = vector.shape_cast %113 : vector<16x8xf32> to vector<2x8x8xf32>
    %115 = vector.extract_strided_slice %48 {offsets = [0, 24], sizes = [16, 8], strides = [1, 1]} : vector<16x32xf32> to vector<16x8xf32>
    %116 = vector.shape_cast %115 : vector<16x8xf32> to vector<2x8x8xf32>
    %117 = vector.extract_strided_slice %49 {offsets = [0, 24], sizes = [16, 8], strides = [1, 1]} : vector<16x32xf32> to vector<16x8xf32>
    %118 = vector.shape_cast %117 : vector<16x8xf32> to vector<2x8x8xf32>
    "tpu.trace_start"() <{level = 10 : i32, message = "bqd,bkd->bqk"}> : () -> ()
    %cst_38 = arith.constant dense<0.000000e+00> : vector<2x8x8xf32>
    %119 = tpu.matmul %114, %116, %cst_38 {dimension_numbers = #tpu.dot_dimension_numbers<[2], [2], [1], [1], [0, 0, 0, 1, 1, 1], [0], [0]>} : vector<2x8x8xf32>, vector<2x8x8xf32>, vector<2x8x8xf32> -> vector<2x8x8xf32>
    "tpu.trace_stop"() : () -> ()
    %cst_39 = arith.constant 0.353553385 : f32
    %120 = vector.broadcast %cst_39 : f32 to vector<2x8x8xf32>
    %121 = arith.mulf %119, %120 : vector<2x8x8xf32>
    %cst_40 = arith.constant dense<0xFF800000> : vector<2x8xf32>
    %122 = vector.multi_reduction <maximumf>, %121, %cst_40 [2] : vector<2x8x8xf32> to vector<2x8xf32>
    %123 = vector.shape_cast %122 : vector<2x8xf32> to vector<2x8x1xf32>
    %124 = vector.broadcast %123 : vector<2x8x1xf32> to vector<2x8x8xf32>
    %125 = arith.subf %121, %124 : vector<2x8x8xf32>
    %126 = math.exp %125 : vector<2x8x8xf32>
    %cst_41 = arith.constant dense<0.000000e+00> : vector<2x8xf32>
    %127 = vector.multi_reduction <add>, %126, %cst_41 [2] : vector<2x8x8xf32> to vector<2x8xf32>
    %128 = vector.shape_cast %127 : vector<2x8xf32> to vector<2x8x1xf32>
    %129 = tpu.reciprocal %128 {approx = true} : vector<2x8x1xf32> -> vector<2x8x1xf32>
    %130 = vector.broadcast %129 : vector<2x8x1xf32> to vector<2x8x8xf32>
    %131 = arith.mulf %126, %130 : vector<2x8x8xf32>
    "tpu.trace_start"() <{level = 10 : i32, message = "bqk,bkd->bqd"}> : () -> ()
    %cst_42 = arith.constant dense<0.000000e+00> : vector<2x8x8xf32>
    %132 = tpu.matmul %131, %118, %cst_42 {dimension_numbers = #tpu.dot_dimension_numbers<[2], [1], [1], [2], [0, 0, 0, 1, 1, 2], [0], [0]>} : vector<2x8x8xf32>, vector<2x8x8xf32>, vector<2x8x8xf32> -> vector<2x8x8xf32>
    "tpu.trace_stop"() : () -> ()
    %133 = vector.shape_cast %132 : vector<2x8x8xf32> to vector<16x8xf32>
    %134 = tpu.concatenate %70, %91, %112, %133 in 1 : vector<16x8xf32>, vector<16x8xf32>, vector<16x8xf32>, vector<16x8xf32> -> vector<16x32xf32>
    %c0_43 = arith.constant 0 : index
    %c0_44 = arith.constant 0 : index
    %c0_45 = arith.constant 0 : index
    %135 = vector.load %arg8[%c0_43, %c0_44, %c0_45] : memref<2x32x32xf32, #tpu.memory_space<vmem>>, vector<1x32x32xf32>
    %136 = vector.shape_cast %135 : vector<1x32x32xf32> to vector<32x32xf32>
    %137 = arith.truncf %134 : vector<16x32xf32> to vector<16x32xbf16>
    %138 = arith.truncf %136 : vector<32x32xf32> to vector<32x32xbf16>
    %cst_46 = arith.constant dense<0.000000e+00> : vector<16x32xf32>
    %139 = tpu.matmul %137, %138, %cst_46 {dimension_numbers = #tpu.dot_dimension_numbers<[1], [0], [0], [1], [0, 0, 1, 1], [], []>} : vector<16x32xbf16>, vector<32x32xbf16>, vector<16x32xf32> -> vector<16x32xf32>
    %c0_47 = arith.constant 0 : index
    %c0_48 = arith.constant 0 : index
    %c0_49 = arith.constant 0 : index
    %140 = vector.load %arg9[%c0_47, %c0_48, %c0_49] : memref<2x1x32xf32, #tpu.memory_space<vmem>>, vector<1x1x32xf32>
    %141 = vector.shape_cast %140 : vector<1x1x32xf32> to vector<1x32xf32>
    %142 = vector.broadcast %141 : vector<1x32xf32> to vector<16x32xf32>
    %143 = arith.addf %139, %142 : vector<16x32xf32>
    %144 = arith.addf %143, %37 : vector<16x32xf32>
    %c0_50 = arith.constant 0 : index
    %c0_51 = arith.constant 0 : index
    %c0_52 = arith.constant 0 : index
    %145 = vector.load %arg10[%c0_50, %c0_51, %c0_52] : memref<2x1x32xf32, #tpu.memory_space<vmem>>, vector<1x1x32xf32>
    %146 = vector.shape_cast %145 : vector<1x1x32xf32> to vector<1x32xf32>
    %c0_53 = arith.constant 0 : index
    %c0_54 = arith.constant 0 : index
    %c0_55 = arith.constant 0 : index
    %147 = vector.load %arg11[%c0_53, %c0_54, %c0_55] : memref<2x1x32xf32, #tpu.memory_space<vmem>>, vector<1x1x32xf32>
    %148 = vector.shape_cast %147 : vector<1x1x32xf32> to vector<1x32xf32>
    %cst_56 = arith.constant dense<0.000000e+00> : vector<16xf32>
    %149 = vector.multi_reduction <add>, %144, %cst_56 [1] : vector<16x32xf32> to vector<16xf32>
    %150 = vector.shape_cast %149 : vector<16xf32> to vector<16x1xf32>
    %cst_57 = arith.constant 3.200000e+01 : f32
    %151 = vector.broadcast %cst_57 : f32 to vector<16x1xf32>
    %152 = arith.divf %150, %151 : vector<16x1xf32>
    %153 = vector.broadcast %152 : vector<16x1xf32> to vector<16x32xf32>
    %154 = arith.subf %144, %153 : vector<16x32xf32>
    %155 = arith.mulf %154, %154 : vector<16x32xf32>
    %cst_58 = arith.constant dense<0.000000e+00> : vector<16xf32>
    %156 = vector.multi_reduction <add>, %155, %cst_58 [1] : vector<16x32xf32> to vector<16xf32>
    %157 = vector.shape_cast %156 : vector<16xf32> to vector<16x1xf32>
    %cst_59 = arith.constant 3.200000e+01 : f32
    %158 = vector.broadcast %cst_59 : f32 to vector<16x1xf32>
    %159 = arith.divf %157, %158 : vector<16x1xf32>
    %cst_60 = arith.constant 9.99999996E-13 : f32
    %160 = vector.broadcast %cst_60 : f32 to vector<16x1xf32>
    %161 = arith.addf %159, %160 : vector<16x1xf32>
    %162 = math.rsqrt %161 : vector<16x1xf32>
    %163 = vector.broadcast %162 : vector<16x1xf32> to vector<16x32xf32>
    %164 = arith.mulf %154, %163 : vector<16x32xf32>
    %165 = vector.broadcast %146 : vector<1x32xf32> to vector<16x32xf32>
    %166 = arith.mulf %164, %165 : vector<16x32xf32>
    %167 = vector.broadcast %148 : vector<1x32xf32> to vector<16x32xf32>
    %168 = arith.addf %166, %167 : vector<16x32xf32>
    %c0_61 = arith.constant 0 : index
    %c0_62 = arith.constant 0 : index
    %c0_63 = arith.constant 0 : index
    %169 = vector.load %arg12[%c0_61, %c0_62, %c0_63] : memref<2x32x64xf32, #tpu.memory_space<vmem>>, vector<1x32x64xf32>
    %170 = vector.shape_cast %169 : vector<1x32x64xf32> to vector<32x64xf32>
    %171 = arith.truncf %168 : vector<16x32xf32> to vector<16x32xbf16>
    %172 = arith.truncf %170 : vector<32x64xf32> to vector<32x64xbf16>
    %cst_64 = arith.constant dense<0.000000e+00> : vector<16x64xf32>
    %173 = tpu.matmul %171, %172, %cst_64 {dimension_numbers = #tpu.dot_dimension_numbers<[1], [0], [0], [1], [0, 0, 1, 1], [], []>} : vector<16x32xbf16>, vector<32x64xbf16>, vector<16x64xf32> -> vector<16x64xf32>
    %c0_65 = arith.constant 0 : index
    %c0_66 = arith.constant 0 : index
    %c0_67 = arith.constant 0 : index
    %174 = vector.load %arg13[%c0_65, %c0_66, %c0_67] : memref<2x1x64xf32, #tpu.memory_space<vmem>>, vector<1x1x64xf32>
    %175 = vector.shape_cast %174 : vector<1x1x64xf32> to vector<1x64xf32>
    %176 = vector.broadcast %175 : vector<1x64xf32> to vector<16x64xf32>
    %177 = arith.addf %173, %176 : vector<16x64xf32>
    %cst_68 = arith.constant 5.000000e-01 : f32
    %178 = vector.broadcast %cst_68 : f32 to vector<16x64xf32>
    %179 = arith.mulf %178, %177 : vector<16x64xf32>
    %cst_69 = arith.constant 4.471500e-02 : f32
    %180 = vector.broadcast %cst_69 : f32 to vector<16x64xf32>
    %181 = arith.mulf %180, %177 : vector<16x64xf32>
    %182 = arith.mulf %181, %177 : vector<16x64xf32>
    %183 = arith.mulf %182, %177 : vector<16x64xf32>
    %184 = arith.addf %177, %183 : vector<16x64xf32>
    %cst_70 = arith.constant 0.797884583 : f32
    %185 = vector.broadcast %cst_70 : f32 to vector<16x64xf32>
    %186 = arith.mulf %185, %184 : vector<16x64xf32>
    %187 = math.tanh %186 : vector<16x64xf32>
    %cst_71 = arith.constant 1.000000e+00 : f32
    %188 = vector.broadcast %cst_71 : f32 to vector<16x64xf32>
    %189 = arith.addf %188, %187 : vector<16x64xf32>
    %190 = arith.mulf %179, %189 : vector<16x64xf32>
    %c0_72 = arith.constant 0 : index
    %c0_73 = arith.constant 0 : index
    %c0_74 = arith.constant 0 : index
    %191 = vector.load %arg14[%c0_72, %c0_73, %c0_74] : memref<2x64x32xf32, #tpu.memory_space<vmem>>, vector<1x64x32xf32>
    %192 = vector.shape_cast %191 : vector<1x64x32xf32> to vector<64x32xf32>
    %193 = arith.truncf %190 : vector<16x64xf32> to vector<16x64xbf16>
    %194 = arith.truncf %192 : vector<64x32xf32> to vector<64x32xbf16>
    %cst_75 = arith.constant dense<0.000000e+00> : vector<16x32xf32>
    %195 = tpu.matmul %193, %194, %cst_75 {dimension_numbers = #tpu.dot_dimension_numbers<[1], [0], [0], [1], [0, 0, 1, 1], [], []>} : vector<16x64xbf16>, vector<64x32xbf16>, vector<16x32xf32> -> vector<16x32xf32>
    %c0_76 = arith.constant 0 : index
    %c0_77 = arith.constant 0 : index
    %c0_78 = arith.constant 0 : index
    %196 = vector.load %arg15[%c0_76, %c0_77, %c0_78] : memref<2x1x32xf32, #tpu.memory_space<vmem>>, vector<1x1x32xf32>
    %197 = vector.shape_cast %196 : vector<1x1x32xf32> to vector<1x32xf32>
    %198 = vector.broadcast %197 : vector<1x32xf32> to vector<16x32xf32>
    %199 = arith.addf %195, %198 : vector<16x32xf32>
    %200 = arith.addf %199, %168 : vector<16x32xf32>
    %c0_79 = arith.constant 0 : index
    %c0_80 = arith.constant 0 : index
    %c0_81 = arith.constant 0 : index
    %201 = vector.load %arg16[%c0_79, %c0_80, %c0_81] : memref<2x1x32xf32, #tpu.memory_space<vmem>>, vector<1x1x32xf32>
    %202 = vector.shape_cast %201 : vector<1x1x32xf32> to vector<1x32xf32>
    %c0_82 = arith.constant 0 : index
    %c0_83 = arith.constant 0 : index
    %c0_84 = arith.constant 0 : index
    %203 = vector.load %arg17[%c0_82, %c0_83, %c0_84] : memref<2x1x32xf32, #tpu.memory_space<vmem>>, vector<1x1x32xf32>
    %204 = vector.shape_cast %203 : vector<1x1x32xf32> to vector<1x32xf32>
    %cst_85 = arith.constant dense<0.000000e+00> : vector<16xf32>
    %205 = vector.multi_reduction <add>, %200, %cst_85 [1] : vector<16x32xf32> to vector<16xf32>
    %206 = vector.shape_cast %205 : vector<16xf32> to vector<16x1xf32>
    %cst_86 = arith.constant 3.200000e+01 : f32
    %207 = vector.broadcast %cst_86 : f32 to vector<16x1xf32>
    %208 = arith.divf %206, %207 : vector<16x1xf32>
    %209 = vector.broadcast %208 : vector<16x1xf32> to vector<16x32xf32>
    %210 = arith.subf %200, %209 : vector<16x32xf32>
    %211 = arith.mulf %210, %210 : vector<16x32xf32>
    %cst_87 = arith.constant dense<0.000000e+00> : vector<16xf32>
    %212 = vector.multi_reduction <add>, %211, %cst_87 [1] : vector<16x32xf32> to vector<16xf32>
    %213 = vector.shape_cast %212 : vector<16xf32> to vector<16x1xf32>
    %cst_88 = arith.constant 3.200000e+01 : f32
    %214 = vector.broadcast %cst_88 : f32 to vector<16x1xf32>
    %215 = arith.divf %213, %214 : vector<16x1xf32>
    %cst_89 = arith.constant 9.99999996E-13 : f32
    %216 = vector.broadcast %cst_89 : f32 to vector<16x1xf32>
    %217 = arith.addf %215, %216 : vector<16x1xf32>
    %218 = math.rsqrt %217 : vector<16x1xf32>
    %219 = vector.broadcast %218 : vector<16x1xf32> to vector<16x32xf32>
    %220 = arith.mulf %210, %219 : vector<16x32xf32>
    %221 = vector.broadcast %202 : vector<1x32xf32> to vector<16x32xf32>
    %222 = arith.mulf %220, %221 : vector<16x32xf32>
    %223 = vector.broadcast %204 : vector<1x32xf32> to vector<16x32xf32>
    %224 = arith.addf %222, %223 : vector<16x32xf32>
    %c1 = arith.constant 1 : index
    %c0_90 = arith.constant 0 : index
    %c0_91 = arith.constant 0 : index
    %225 = vector.load %arg6[%c1, %c0_90, %c0_91] : memref<2x32x96xf32, #tpu.memory_space<vmem>>, vector<1x32x96xf32>
    %226 = vector.shape_cast %225 : vector<1x32x96xf32> to vector<32x96xf32>
    %227 = arith.truncf %224 : vector<16x32xf32> to vector<16x32xbf16>
    %228 = arith.truncf %226 : vector<32x96xf32> to vector<32x96xbf16>
    %cst_92 = arith.constant dense<0.000000e+00> : vector<16x96xf32>
    %229 = tpu.matmul %227, %228, %cst_92 {dimension_numbers = #tpu.dot_dimension_numbers<[1], [0], [0], [1], [0, 0, 1, 1], [], []>} : vector<16x32xbf16>, vector<32x96xbf16>, vector<16x96xf32> -> vector<16x96xf32>
    %c1_93 = arith.constant 1 : index
    %c0_94 = arith.constant 0 : index
    %c0_95 = arith.constant 0 : index
    %230 = vector.load %arg7[%c1_93, %c0_94, %c0_95] : memref<2x1x96xf32, #tpu.memory_space<vmem>>, vector<1x1x96xf32>
    %231 = vector.shape_cast %230 : vector<1x1x96xf32> to vector<1x96xf32>
    %232 = vector.broadcast %231 : vector<1x96xf32> to vector<16x96xf32>
    %233 = arith.addf %229, %232 : vector<16x96xf32>
    %234 = vector.extract_strided_slice %233 {offsets = [0, 0], sizes = [16, 32], strides = [1, 1]} : vector<16x96xf32> to vector<16x32xf32>
    %235 = vector.extract_strided_slice %233 {offsets = [0, 32], sizes = [16, 32], strides = [1, 1]} : vector<16x96xf32> to vector<16x32xf32>
    %236 = vector.extract_strided_slice %233 {offsets = [0, 64], sizes = [16, 32], strides = [1, 1]} : vector<16x96xf32> to vector<16x32xf32>
    %237 = vector.extract_strided_slice %234 {offsets = [0, 0], sizes = [16, 8], strides = [1, 1]} : vector<16x32xf32> to vector<16x8xf32>
    %238 = vector.shape_cast %237 : vector<16x8xf32> to vector<2x8x8xf32>
    %239 = vector.extract_strided_slice %235 {offsets = [0, 0], sizes = [16, 8], strides = [1, 1]} : vector<16x32xf32> to vector<16x8xf32>
    %240 = vector.shape_cast %239 : vector<16x8xf32> to vector<2x8x8xf32>
    %241 = vector.extract_strided_slice %236 {offsets = [0, 0], sizes = [16, 8], strides = [1, 1]} : vector<16x32xf32> to vector<16x8xf32>
    %242 = vector.shape_cast %241 : vector<16x8xf32> to vector<2x8x8xf32>
    "tpu.trace_start"() <{level = 10 : i32, message = "bqd,bkd->bqk"}> : () -> ()
    %cst_96 = arith.constant dense<0.000000e+00> : vector<2x8x8xf32>
    %243 = tpu.matmul %238, %240, %cst_96 {dimension_numbers = #tpu.dot_dimension_numbers<[2], [2], [1], [1], [0, 0, 0, 1, 1, 1], [0], [0]>} : vector<2x8x8xf32>, vector<2x8x8xf32>, vector<2x8x8xf32> -> vector<2x8x8xf32>
    "tpu.trace_stop"() : () -> ()
    %cst_97 = arith.constant 0.353553385 : f32
    %244 = vector.broadcast %cst_97 : f32 to vector<2x8x8xf32>
    %245 = arith.mulf %243, %244 : vector<2x8x8xf32>
    %cst_98 = arith.constant dense<0xFF800000> : vector<2x8xf32>
    %246 = vector.multi_reduction <maximumf>, %245, %cst_98 [2] : vector<2x8x8xf32> to vector<2x8xf32>
    %247 = vector.shape_cast %246 : vector<2x8xf32> to vector<2x8x1xf32>
    %248 = vector.broadcast %247 : vector<2x8x1xf32> to vector<2x8x8xf32>
    %249 = arith.subf %245, %248 : vector<2x8x8xf32>
    %250 = math.exp %249 : vector<2x8x8xf32>
    %cst_99 = arith.constant dense<0.000000e+00> : vector<2x8xf32>
    %251 = vector.multi_reduction <add>, %250, %cst_99 [2] : vector<2x8x8xf32> to vector<2x8xf32>
    %252 = vector.shape_cast %251 : vector<2x8xf32> to vector<2x8x1xf32>
    %253 = tpu.reciprocal %252 {approx = true} : vector<2x8x1xf32> -> vector<2x8x1xf32>
    %254 = vector.broadcast %253 : vector<2x8x1xf32> to vector<2x8x8xf32>
    %255 = arith.mulf %250, %254 : vector<2x8x8xf32>
    "tpu.trace_start"() <{level = 10 : i32, message = "bqk,bkd->bqd"}> : () -> ()
    %cst_100 = arith.constant dense<0.000000e+00> : vector<2x8x8xf32>
    %256 = tpu.matmul %255, %242, %cst_100 {dimension_numbers = #tpu.dot_dimension_numbers<[2], [1], [1], [2], [0, 0, 0, 1, 1, 2], [0], [0]>} : vector<2x8x8xf32>, vector<2x8x8xf32>, vector<2x8x8xf32> -> vector<2x8x8xf32>
    "tpu.trace_stop"() : () -> ()
    %257 = vector.shape_cast %256 : vector<2x8x8xf32> to vector<16x8xf32>
    %258 = vector.extract_strided_slice %234 {offsets = [0, 8], sizes = [16, 8], strides = [1, 1]} : vector<16x32xf32> to vector<16x8xf32>
    %259 = vector.shape_cast %258 : vector<16x8xf32> to vector<2x8x8xf32>
    %260 = vector.extract_strided_slice %235 {offsets = [0, 8], sizes = [16, 8], strides = [1, 1]} : vector<16x32xf32> to vector<16x8xf32>
    %261 = vector.shape_cast %260 : vector<16x8xf32> to vector<2x8x8xf32>
    %262 = vector.extract_strided_slice %236 {offsets = [0, 8], sizes = [16, 8], strides = [1, 1]} : vector<16x32xf32> to vector<16x8xf32>
    %263 = vector.shape_cast %262 : vector<16x8xf32> to vector<2x8x8xf32>
    "tpu.trace_start"() <{level = 10 : i32, message = "bqd,bkd->bqk"}> : () -> ()
    %cst_101 = arith.constant dense<0.000000e+00> : vector<2x8x8xf32>
    %264 = tpu.matmul %259, %261, %cst_101 {dimension_numbers = #tpu.dot_dimension_numbers<[2], [2], [1], [1], [0, 0, 0, 1, 1, 1], [0], [0]>} : vector<2x8x8xf32>, vector<2x8x8xf32>, vector<2x8x8xf32> -> vector<2x8x8xf32>
    "tpu.trace_stop"() : () -> ()
    %cst_102 = arith.constant 0.353553385 : f32
    %265 = vector.broadcast %cst_102 : f32 to vector<2x8x8xf32>
    %266 = arith.mulf %264, %265 : vector<2x8x8xf32>
    %cst_103 = arith.constant dense<0xFF800000> : vector<2x8xf32>
    %267 = vector.multi_reduction <maximumf>, %266, %cst_103 [2] : vector<2x8x8xf32> to vector<2x8xf32>
    %268 = vector.shape_cast %267 : vector<2x8xf32> to vector<2x8x1xf32>
    %269 = vector.broadcast %268 : vector<2x8x1xf32> to vector<2x8x8xf32>
    %270 = arith.subf %266, %269 : vector<2x8x8xf32>
    %271 = math.exp %270 : vector<2x8x8xf32>
    %cst_104 = arith.constant dense<0.000000e+00> : vector<2x8xf32>
    %272 = vector.multi_reduction <add>, %271, %cst_104 [2] : vector<2x8x8xf32> to vector<2x8xf32>
    %273 = vector.shape_cast %272 : vector<2x8xf32> to vector<2x8x1xf32>
    %274 = tpu.reciprocal %273 {approx = true} : vector<2x8x1xf32> -> vector<2x8x1xf32>
    %275 = vector.broadcast %274 : vector<2x8x1xf32> to vector<2x8x8xf32>
    %276 = arith.mulf %271, %275 : vector<2x8x8xf32>
    "tpu.trace_start"() <{level = 10 : i32, message = "bqk,bkd->bqd"}> : () -> ()
    %cst_105 = arith.constant dense<0.000000e+00> : vector<2x8x8xf32>
    %277 = tpu.matmul %276, %263, %cst_105 {dimension_numbers = #tpu.dot_dimension_numbers<[2], [1], [1], [2], [0, 0, 0, 1, 1, 2], [0], [0]>} : vector<2x8x8xf32>, vector<2x8x8xf32>, vector<2x8x8xf32> -> vector<2x8x8xf32>
    "tpu.trace_stop"() : () -> ()
    %278 = vector.shape_cast %277 : vector<2x8x8xf32> to vector<16x8xf32>
    %279 = vector.extract_strided_slice %234 {offsets = [0, 16], sizes = [16, 8], strides = [1, 1]} : vector<16x32xf32> to vector<16x8xf32>
    %280 = vector.shape_cast %279 : vector<16x8xf32> to vector<2x8x8xf32>
    %281 = vector.extract_strided_slice %235 {offsets = [0, 16], sizes = [16, 8], strides = [1, 1]} : vector<16x32xf32> to vector<16x8xf32>
    %282 = vector.shape_cast %281 : vector<16x8xf32> to vector<2x8x8xf32>
    %283 = vector.extract_strided_slice %236 {offsets = [0, 16], sizes = [16, 8], strides = [1, 1]} : vector<16x32xf32> to vector<16x8xf32>
    %284 = vector.shape_cast %283 : vector<16x8xf32> to vector<2x8x8xf32>
    "tpu.trace_start"() <{level = 10 : i32, message = "bqd,bkd->bqk"}> : () -> ()
    %cst_106 = arith.constant dense<0.000000e+00> : vector<2x8x8xf32>
    %285 = tpu.matmul %280, %282, %cst_106 {dimension_numbers = #tpu.dot_dimension_numbers<[2], [2], [1], [1], [0, 0, 0, 1, 1, 1], [0], [0]>} : vector<2x8x8xf32>, vector<2x8x8xf32>, vector<2x8x8xf32> -> vector<2x8x8xf32>
    "tpu.trace_stop"() : () -> ()
    %cst_107 = arith.constant 0.353553385 : f32
    %286 = vector.broadcast %cst_107 : f32 to vector<2x8x8xf32>
    %287 = arith.mulf %285, %286 : vector<2x8x8xf32>
    %cst_108 = arith.constant dense<0xFF800000> : vector<2x8xf32>
    %288 = vector.multi_reduction <maximumf>, %287, %cst_108 [2] : vector<2x8x8xf32> to vector<2x8xf32>
    %289 = vector.shape_cast %288 : vector<2x8xf32> to vector<2x8x1xf32>
    %290 = vector.broadcast %289 : vector<2x8x1xf32> to vector<2x8x8xf32>
    %291 = arith.subf %287, %290 : vector<2x8x8xf32>
    %292 = math.exp %291 : vector<2x8x8xf32>
    %cst_109 = arith.constant dense<0.000000e+00> : vector<2x8xf32>
    %293 = vector.multi_reduction <add>, %292, %cst_109 [2] : vector<2x8x8xf32> to vector<2x8xf32>
    %294 = vector.shape_cast %293 : vector<2x8xf32> to vector<2x8x1xf32>
    %295 = tpu.reciprocal %294 {approx = true} : vector<2x8x1xf32> -> vector<2x8x1xf32>
    %296 = vector.broadcast %295 : vector<2x8x1xf32> to vector<2x8x8xf32>
    %297 = arith.mulf %292, %296 : vector<2x8x8xf32>
    "tpu.trace_start"() <{level = 10 : i32, message = "bqk,bkd->bqd"}> : () -> ()
    %cst_110 = arith.constant dense<0.000000e+00> : vector<2x8x8xf32>
    %298 = tpu.matmul %297, %284, %cst_110 {dimension_numbers = #tpu.dot_dimension_numbers<[2], [1], [1], [2], [0, 0, 0, 1, 1, 2], [0], [0]>} : vector<2x8x8xf32>, vector<2x8x8xf32>, vector<2x8x8xf32> -> vector<2x8x8xf32>
    "tpu.trace_stop"() : () -> ()
    %299 = vector.shape_cast %298 : vector<2x8x8xf32> to vector<16x8xf32>
    %300 = vector.extract_strided_slice %234 {offsets = [0, 24], sizes = [16, 8], strides = [1, 1]} : vector<16x32xf32> to vector<16x8xf32>
    %301 = vector.shape_cast %300 : vector<16x8xf32> to vector<2x8x8xf32>
    %302 = vector.extract_strided_slice %235 {offsets = [0, 24], sizes = [16, 8], strides = [1, 1]} : vector<16x32xf32> to vector<16x8xf32>
    %303 = vector.shape_cast %302 : vector<16x8xf32> to vector<2x8x8xf32>
    %304 = vector.extract_strided_slice %236 {offsets = [0, 24], sizes = [16, 8], strides = [1, 1]} : vector<16x32xf32> to vector<16x8xf32>
    %305 = vector.shape_cast %304 : vector<16x8xf32> to vector<2x8x8xf32>
    "tpu.trace_start"() <{level = 10 : i32, message = "bqd,bkd->bqk"}> : () -> ()
    %cst_111 = arith.constant dense<0.000000e+00> : vector<2x8x8xf32>
    %306 = tpu.matmul %301, %303, %cst_111 {dimension_numbers = #tpu.dot_dimension_numbers<[2], [2], [1], [1], [0, 0, 0, 1, 1, 1], [0], [0]>} : vector<2x8x8xf32>, vector<2x8x8xf32>, vector<2x8x8xf32> -> vector<2x8x8xf32>
    "tpu.trace_stop"() : () -> ()
    %cst_112 = arith.constant 0.353553385 : f32
    %307 = vector.broadcast %cst_112 : f32 to vector<2x8x8xf32>
    %308 = arith.mulf %306, %307 : vector<2x8x8xf32>
    %cst_113 = arith.constant dense<0xFF800000> : vector<2x8xf32>
    %309 = vector.multi_reduction <maximumf>, %308, %cst_113 [2] : vector<2x8x8xf32> to vector<2x8xf32>
    %310 = vector.shape_cast %309 : vector<2x8xf32> to vector<2x8x1xf32>
    %311 = vector.broadcast %310 : vector<2x8x1xf32> to vector<2x8x8xf32>
    %312 = arith.subf %308, %311 : vector<2x8x8xf32>
    %313 = math.exp %312 : vector<2x8x8xf32>
    %cst_114 = arith.constant dense<0.000000e+00> : vector<2x8xf32>
    %314 = vector.multi_reduction <add>, %313, %cst_114 [2] : vector<2x8x8xf32> to vector<2x8xf32>
    %315 = vector.shape_cast %314 : vector<2x8xf32> to vector<2x8x1xf32>
    %316 = tpu.reciprocal %315 {approx = true} : vector<2x8x1xf32> -> vector<2x8x1xf32>
    %317 = vector.broadcast %316 : vector<2x8x1xf32> to vector<2x8x8xf32>
    %318 = arith.mulf %313, %317 : vector<2x8x8xf32>
    "tpu.trace_start"() <{level = 10 : i32, message = "bqk,bkd->bqd"}> : () -> ()
    %cst_115 = arith.constant dense<0.000000e+00> : vector<2x8x8xf32>
    %319 = tpu.matmul %318, %305, %cst_115 {dimension_numbers = #tpu.dot_dimension_numbers<[2], [1], [1], [2], [0, 0, 0, 1, 1, 2], [0], [0]>} : vector<2x8x8xf32>, vector<2x8x8xf32>, vector<2x8x8xf32> -> vector<2x8x8xf32>
    "tpu.trace_stop"() : () -> ()
    %320 = vector.shape_cast %319 : vector<2x8x8xf32> to vector<16x8xf32>
    %321 = tpu.concatenate %257, %278, %299, %320 in 1 : vector<16x8xf32>, vector<16x8xf32>, vector<16x8xf32>, vector<16x8xf32> -> vector<16x32xf32>
    %c1_116 = arith.constant 1 : index
    %c0_117 = arith.constant 0 : index
    %c0_118 = arith.constant 0 : index
    %322 = vector.load %arg8[%c1_116, %c0_117, %c0_118] : memref<2x32x32xf32, #tpu.memory_space<vmem>>, vector<1x32x32xf32>
    %323 = vector.shape_cast %322 : vector<1x32x32xf32> to vector<32x32xf32>
    %324 = arith.truncf %321 : vector<16x32xf32> to vector<16x32xbf16>
    %325 = arith.truncf %323 : vector<32x32xf32> to vector<32x32xbf16>
    %cst_119 = arith.constant dense<0.000000e+00> : vector<16x32xf32>
    %326 = tpu.matmul %324, %325, %cst_119 {dimension_numbers = #tpu.dot_dimension_numbers<[1], [0], [0], [1], [0, 0, 1, 1], [], []>} : vector<16x32xbf16>, vector<32x32xbf16>, vector<16x32xf32> -> vector<16x32xf32>
    %c1_120 = arith.constant 1 : index
    %c0_121 = arith.constant 0 : index
    %c0_122 = arith.constant 0 : index
    %327 = vector.load %arg9[%c1_120, %c0_121, %c0_122] : memref<2x1x32xf32, #tpu.memory_space<vmem>>, vector<1x1x32xf32>
    %328 = vector.shape_cast %327 : vector<1x1x32xf32> to vector<1x32xf32>
    %329 = vector.broadcast %328 : vector<1x32xf32> to vector<16x32xf32>
    %330 = arith.addf %326, %329 : vector<16x32xf32>
    %331 = arith.addf %330, %224 : vector<16x32xf32>
    %c1_123 = arith.constant 1 : index
    %c0_124 = arith.constant 0 : index
    %c0_125 = arith.constant 0 : index
    %332 = vector.load %arg10[%c1_123, %c0_124, %c0_125] : memref<2x1x32xf32, #tpu.memory_space<vmem>>, vector<1x1x32xf32>
    %333 = vector.shape_cast %332 : vector<1x1x32xf32> to vector<1x32xf32>
    %c1_126 = arith.constant 1 : index
    %c0_127 = arith.constant 0 : index
    %c0_128 = arith.constant 0 : index
    %334 = vector.load %arg11[%c1_126, %c0_127, %c0_128] : memref<2x1x32xf32, #tpu.memory_space<vmem>>, vector<1x1x32xf32>
    %335 = vector.shape_cast %334 : vector<1x1x32xf32> to vector<1x32xf32>
    %cst_129 = arith.constant dense<0.000000e+00> : vector<16xf32>
    %336 = vector.multi_reduction <add>, %331, %cst_129 [1] : vector<16x32xf32> to vector<16xf32>
    %337 = vector.shape_cast %336 : vector<16xf32> to vector<16x1xf32>
    %cst_130 = arith.constant 3.200000e+01 : f32
    %338 = vector.broadcast %cst_130 : f32 to vector<16x1xf32>
    %339 = arith.divf %337, %338 : vector<16x1xf32>
    %340 = vector.broadcast %339 : vector<16x1xf32> to vector<16x32xf32>
    %341 = arith.subf %331, %340 : vector<16x32xf32>
    %342 = arith.mulf %341, %341 : vector<16x32xf32>
    %cst_131 = arith.constant dense<0.000000e+00> : vector<16xf32>
    %343 = vector.multi_reduction <add>, %342, %cst_131 [1] : vector<16x32xf32> to vector<16xf32>
    %344 = vector.shape_cast %343 : vector<16xf32> to vector<16x1xf32>
    %cst_132 = arith.constant 3.200000e+01 : f32
    %345 = vector.broadcast %cst_132 : f32 to vector<16x1xf32>
    %346 = arith.divf %344, %345 : vector<16x1xf32>
    %cst_133 = arith.constant 9.99999996E-13 : f32
    %347 = vector.broadcast %cst_133 : f32 to vector<16x1xf32>
    %348 = arith.addf %346, %347 : vector<16x1xf32>
    %349 = math.rsqrt %348 : vector<16x1xf32>
    %350 = vector.broadcast %349 : vector<16x1xf32> to vector<16x32xf32>
    %351 = arith.mulf %341, %350 : vector<16x32xf32>
    %352 = vector.broadcast %333 : vector<1x32xf32> to vector<16x32xf32>
    %353 = arith.mulf %351, %352 : vector<16x32xf32>
    %354 = vector.broadcast %335 : vector<1x32xf32> to vector<16x32xf32>
    %355 = arith.addf %353, %354 : vector<16x32xf32>
    %c1_134 = arith.constant 1 : index
    %c0_135 = arith.constant 0 : index
    %c0_136 = arith.constant 0 : index
    %356 = vector.load %arg12[%c1_134, %c0_135, %c0_136] : memref<2x32x64xf32, #tpu.memory_space<vmem>>, vector<1x32x64xf32>
    %357 = vector.shape_cast %356 : vector<1x32x64xf32> to vector<32x64xf32>
    %358 = arith.truncf %355 : vector<16x32xf32> to vector<16x32xbf16>
    %359 = arith.truncf %357 : vector<32x64xf32> to vector<32x64xbf16>
    %cst_137 = arith.constant dense<0.000000e+00> : vector<16x64xf32>
    %360 = tpu.matmul %358, %359, %cst_137 {dimension_numbers = #tpu.dot_dimension_numbers<[1], [0], [0], [1], [0, 0, 1, 1], [], []>} : vector<16x32xbf16>, vector<32x64xbf16>, vector<16x64xf32> -> vector<16x64xf32>
    %c1_138 = arith.constant 1 : index
    %c0_139 = arith.constant 0 : index
    %c0_140 = arith.constant 0 : index
    %361 = vector.load %arg13[%c1_138, %c0_139, %c0_140] : memref<2x1x64xf32, #tpu.memory_space<vmem>>, vector<1x1x64xf32>
    %362 = vector.shape_cast %361 : vector<1x1x64xf32> to vector<1x64xf32>
    %363 = vector.broadcast %362 : vector<1x64xf32> to vector<16x64xf32>
    %364 = arith.addf %360, %363 : vector<16x64xf32>
    %cst_141 = arith.constant 5.000000e-01 : f32
    %365 = vector.broadcast %cst_141 : f32 to vector<16x64xf32>
    %366 = arith.mulf %365, %364 : vector<16x64xf32>
    %cst_142 = arith.constant 4.471500e-02 : f32
    %367 = vector.broadcast %cst_142 : f32 to vector<16x64xf32>
    %368 = arith.mulf %367, %364 : vector<16x64xf32>
    %369 = arith.mulf %368, %364 : vector<16x64xf32>
    %370 = arith.mulf %369, %364 : vector<16x64xf32>
    %371 = arith.addf %364, %370 : vector<16x64xf32>
    %cst_143 = arith.constant 0.797884583 : f32
    %372 = vector.broadcast %cst_143 : f32 to vector<16x64xf32>
    %373 = arith.mulf %372, %371 : vector<16x64xf32>
    %374 = math.tanh %373 : vector<16x64xf32>
    %cst_144 = arith.constant 1.000000e+00 : f32
    %375 = vector.broadcast %cst_144 : f32 to vector<16x64xf32>
    %376 = arith.addf %375, %374 : vector<16x64xf32>
    %377 = arith.mulf %366, %376 : vector<16x64xf32>
    %c1_145 = arith.constant 1 : index
    %c0_146 = arith.constant 0 : index
    %c0_147 = arith.constant 0 : index
    %378 = vector.load %arg14[%c1_145, %c0_146, %c0_147] : memref<2x64x32xf32, #tpu.memory_space<vmem>>, vector<1x64x32xf32>
    %379 = vector.shape_cast %378 : vector<1x64x32xf32> to vector<64x32xf32>
    %380 = arith.truncf %377 : vector<16x64xf32> to vector<16x64xbf16>
    %381 = arith.truncf %379 : vector<64x32xf32> to vector<64x32xbf16>
    %cst_148 = arith.constant dense<0.000000e+00> : vector<16x32xf32>
    %382 = tpu.matmul %380, %381, %cst_148 {dimension_numbers = #tpu.dot_dimension_numbers<[1], [0], [0], [1], [0, 0, 1, 1], [], []>} : vector<16x64xbf16>, vector<64x32xbf16>, vector<16x32xf32> -> vector<16x32xf32>
    %c1_149 = arith.constant 1 : index
    %c0_150 = arith.constant 0 : index
    %c0_151 = arith.constant 0 : index
    %383 = vector.load %arg15[%c1_149, %c0_150, %c0_151] : memref<2x1x32xf32, #tpu.memory_space<vmem>>, vector<1x1x32xf32>
    %384 = vector.shape_cast %383 : vector<1x1x32xf32> to vector<1x32xf32>
    %385 = vector.broadcast %384 : vector<1x32xf32> to vector<16x32xf32>
    %386 = arith.addf %382, %385 : vector<16x32xf32>
    %387 = arith.addf %386, %355 : vector<16x32xf32>
    %c1_152 = arith.constant 1 : index
    %c0_153 = arith.constant 0 : index
    %c0_154 = arith.constant 0 : index
    %388 = vector.load %arg16[%c1_152, %c0_153, %c0_154] : memref<2x1x32xf32, #tpu.memory_space<vmem>>, vector<1x1x32xf32>
    %389 = vector.shape_cast %388 : vector<1x1x32xf32> to vector<1x32xf32>
    %c1_155 = arith.constant 1 : index
    %c0_156 = arith.constant 0 : index
    %c0_157 = arith.constant 0 : index
    %390 = vector.load %arg17[%c1_155, %c0_156, %c0_157] : memref<2x1x32xf32, #tpu.memory_space<vmem>>, vector<1x1x32xf32>
    %391 = vector.shape_cast %390 : vector<1x1x32xf32> to vector<1x32xf32>
    %cst_158 = arith.constant dense<0.000000e+00> : vector<16xf32>
    %392 = vector.multi_reduction <add>, %387, %cst_158 [1] : vector<16x32xf32> to vector<16xf32>
    %393 = vector.shape_cast %392 : vector<16xf32> to vector<16x1xf32>
    %cst_159 = arith.constant 3.200000e+01 : f32
    %394 = vector.broadcast %cst_159 : f32 to vector<16x1xf32>
    %395 = arith.divf %393, %394 : vector<16x1xf32>
    %396 = vector.broadcast %395 : vector<16x1xf32> to vector<16x32xf32>
    %397 = arith.subf %387, %396 : vector<16x32xf32>
    %398 = arith.mulf %397, %397 : vector<16x32xf32>
    %cst_160 = arith.constant dense<0.000000e+00> : vector<16xf32>
    %399 = vector.multi_reduction <add>, %398, %cst_160 [1] : vector<16x32xf32> to vector<16xf32>
    %400 = vector.shape_cast %399 : vector<16xf32> to vector<16x1xf32>
    %cst_161 = arith.constant 3.200000e+01 : f32
    %401 = vector.broadcast %cst_161 : f32 to vector<16x1xf32>
    %402 = arith.divf %400, %401 : vector<16x1xf32>
    %cst_162 = arith.constant 9.99999996E-13 : f32
    %403 = vector.broadcast %cst_162 : f32 to vector<16x1xf32>
    %404 = arith.addf %402, %403 : vector<16x1xf32>
    %405 = math.rsqrt %404 : vector<16x1xf32>
    %406 = vector.broadcast %405 : vector<16x1xf32> to vector<16x32xf32>
    %407 = arith.mulf %397, %406 : vector<16x32xf32>
    %408 = vector.broadcast %389 : vector<1x32xf32> to vector<16x32xf32>
    %409 = arith.mulf %407, %408 : vector<16x32xf32>
    %410 = vector.broadcast %391 : vector<1x32xf32> to vector<16x32xf32>
    %411 = arith.addf %409, %410 : vector<16x32xf32>
    %412 = vector.extract_strided_slice %411 {offsets = [0, 0], sizes = [1, 32], strides = [1, 1]} : vector<16x32xf32> to vector<1x32xf32>
    %413 = vector.extract_strided_slice %411 {offsets = [8, 0], sizes = [1, 32], strides = [1, 1]} : vector<16x32xf32> to vector<1x32xf32>
    %414 = tpu.concatenate %412, %413 in 0 : vector<1x32xf32>, vector<1x32xf32> -> vector<2x32xf32>
    %c0_163 = arith.constant 0 : index
    %c0_164 = arith.constant 0 : index
    %415 = vector.load %arg18[%c0_163, %c0_164] : memref<32x56xf32, #tpu.memory_space<vmem>>, vector<32x56xf32>
    %cst_165 = arith.constant dense<0.000000e+00> : vector<2x56xf32>
    %416 = tpu.matmul %414, %415, %cst_165 {dimension_numbers = #tpu.dot_dimension_numbers<[1], [0], [0], [1], [0, 0, 1, 1], [], []>} : vector<2x32xf32>, vector<32x56xf32>, vector<2x56xf32> -> vector<2x56xf32>
    %c0_166 = arith.constant 0 : index
    %c0_167 = arith.constant 0 : index
    %417 = vector.load %arg19[%c0_166, %c0_167] : memref<1x56xf32, #tpu.memory_space<vmem>>, vector<1x56xf32>
    %418 = vector.broadcast %417 : vector<1x56xf32> to vector<2x56xf32>
    %419 = arith.addf %416, %418 : vector<2x56xf32>
    %420 = vector.extract_strided_slice %419 {offsets = [0, 0], sizes = [2, 14], strides = [1, 1]} : vector<2x56xf32> to vector<2x14xf32>
    %421 = vector.extract_strided_slice %419 {offsets = [0, 14], sizes = [2, 14], strides = [1, 1]} : vector<2x56xf32> to vector<2x14xf32>
    %422 = vector.extract_strided_slice %419 {offsets = [0, 28], sizes = [2, 14], strides = [1, 1]} : vector<2x56xf32> to vector<2x14xf32>
    %423 = vector.extract_strided_slice %419 {offsets = [0, 42], sizes = [2, 14], strides = [1, 1]} : vector<2x56xf32> to vector<2x14xf32>
    %424 = arith.maximumf %420, %421 : vector<2x14xf32>
    %425 = arith.maximumf %422, %423 : vector<2x14xf32>
    %426 = arith.maximumf %424, %425 : vector<2x14xf32>
    %427 = arith.cmpf oeq, %420, %426 : vector<2x14xf32>
    %428 = arith.cmpf oeq, %421, %426 : vector<2x14xf32>
    %429 = arith.cmpf oeq, %422, %426 : vector<2x14xf32>
    %c2_i32 = arith.constant 2 : i32
    %c3_i32 = arith.constant 3 : i32
    %430 = vector.broadcast %c2_i32 : i32 to vector<2x14xi32>
    %431 = vector.broadcast %c3_i32 : i32 to vector<2x14xi32>
    %432 = arith.select %429, %430, %431 : vector<2x14xi1>, vector<2x14xi32>
    %c1_i32 = arith.constant 1 : i32
    %433 = vector.broadcast %c1_i32 : i32 to vector<2x14xi32>
    %434 = arith.select %428, %433, %432 : vector<2x14xi1>, vector<2x14xi32>
    %c0_i32 = arith.constant 0 : i32
    %435 = vector.broadcast %c0_i32 : i32 to vector<2x14xi32>
    %436 = arith.select %427, %435, %434 : vector<2x14xi1>, vector<2x14xi32>
    %c0_i32_168 = arith.constant 0 : i32
    %437 = vector.broadcast %c0_i32_168 : i32 to vector<2x2xi32>
    %438 = tpu.concatenate %436, %437 in 1 : vector<2x14xi32>, vector<2x2xi32> -> vector<2x16xi32>
    %c0_169 = arith.constant 0 : index
    %c0_170 = arith.constant 0 : index
    %439 = vector.load %arg20[%c0_169, %c0_170] : memref<2x16xi32, #tpu.memory_space<vmem>>, vector<2x16xi32>
    tpu.vector_store %arg20[%c0_169, %c0_170], %438 {strides = array<i32>} : memref<2x16xi32, #tpu.memory_space<vmem>>, vector<2x16xi32>,
    return
  }
}

</mosaic_0001>

<bundles_post_ra>
// kernel: chexbert_forward.1
= control target key start
LH: loop header
LB: loop body
LE: loop exit
PB: predicated region body
PF: predicated region fallthrough
CT: control target
= control target key end

     0   :  { %s5427_s0 = inlined_call_operand.vmem [shape: s32[16,1], index: 0, kind: input, shape index: {}]   ;;  %s5428_s1 = inlined_call_operand.vmem [shape: f32[64,32], index: 1, kind: input, shape index: {}]   ;;  %s5429_s2 = inlined_call_operand.vmem [shape: f32[16,32], index: 2, kind: input, shape index: {}]   ;;  %s5430_s3 = inlined_call_operand.vmem [shape: f32[2,32], index: 3, kind: input, shape index: {}]   ;;  %s5431_s4 = inlined_call_operand.vmem [shape: f32[1,32], index: 4, kind: input, shape index: {}]   ;;  %s5432_s5 = inlined_call_operand.hbm [shape: f32[1,32], index: 5, kind: input, shape index: {}]   ;;  %s5433_s6 = inlined_call_operand.vmem [shape: f32[2,32,96], index: 6, kind: input, shape index: {}]   ;;  %s5434_s7 = inlined_call_operand.vmem [shape: f32[2,1,96], index: 7, kind: input, shape index: {}]   ;;  %s5435_s8 = inlined_call_operand.vmem [shape: f32[2,32,32], index: 8, kind: input, shape index: {}]   ;;  %s5436_s9 = inlined_call_operand.vmem [shape: f32[2,1,32], index: 9, kind: input, shape index: {}]   ;;  %s5437_s10 = inlined_call_operand.vmem [shape: f32[2,1,32], index: 10, kind: input, shape index: {}]   ;;  %s5438_s11 = inlined_call_operand.vmem [shape: f32[2,1,32], index: 11, kind: input, shape index: {}]   ;;  %s5439_s12 = inlined_call_operand.vmem [shape: f32[2,32,64], index: 12, kind: input, shape index: {}]   ;;  %s5440_s13 = inlined_call_operand.vmem [shape: f32[2,1,64], index: 13, kind: input, shape index: {}]   ;;  %s5441_s14 = inlined_call_operand.vmem [shape: f32[2,64,32], index: 14, kind: input, shape index: {}]   ;;  %s5442_s15 = inlined_call_operand.vmem [shape: f32[2,1,32], index: 15, kind: input, shape index: {}]   ;;  %s5443_s16 = inlined_call_operand.hbm [shape: f32[2,1,32], index: 16, kind: input, shape index: {}]   ;;  %s5444_s17 = inlined_call_operand.hbm [shape: f32[2,1,32], index: 17, kind: input, shape index: {}]   ;;  %s5445_s18 = inlined_call_operand.vmem [shape: f32[32,56], index: 18, kind: input, shape index: {}]   ;;  %s5446_s19 = inlined_call_operand.hbm [shape: f32[1,56], index: 19, kind: input, shape index: {}]   ;;  %s5447_s20 = inlined_call_operand.hbm [shape: s32[2,16], index: 20, kind: output, shape index: {}]  }
   0x1   :  { %5454 = sst [smem:[#allocation15_spill]] %s5427_s0 }
   0x2   :  { %5455 = sst [smem:[#allocation16_spill]] %s5428_s1 }
   0x3   :  { %5456 = sst [smem:[#allocation17_spill]] %s5429_s2 }
   0x4   :  { %5457 = sst [smem:[#allocation18_spill]] %s5430_s3 }
   0x5   :  { %5458 = sst [smem:[#allocation19_spill]] %s5431_s4 }
   0x6   :  { %5459 = sst [smem:[#allocation20_spill]] %s5447_s20 }
   0x7   :  { %25 = vsyncpa [#allocation3], 0 }
   0x8   :  { %26 = vsyncpa [#allocation6], 0 }
   0x9   :  { %27 = vsyncpa [#allocation9], 0 }
   0xa   :  { %28 = vsyncpa [#allocation4], 0  ;;  %s4605_s1 = smov [#allocation5]   ;;  %s4487_s2 = scalar_lea.hbm %s5443_s16, 32 }
   0xb   :  { %s74_s22 = sshll.u32 %s4605_s1, 4  ;;  %p4488_p0 = scmp.ne.s32.totalorder %s5443_s16, %s4487_s2  ;;  %s75_s22 = int_to_ptr.vmem [resolvable:$true] %s74_s22 }
   0xc   :  { %p4491_p1 = scmp.lt.u32.totalorder %s4487_s2, %s5443_s16 }
   0xe   :  { %p4493_p2 = pnand %p4491_p1, %p4488_p0 }
  0x10   :  { %4496 = shalt.err (!%p4493_p2)
}
  0x11   :  { %s4497_s28 = scalar_lea.vmem %s75_s22, 32  ;;  %p4502_p4 = scmp.lt.s32.totalorder %s75_s22, %s75_s22 }
  0x12   :  { %p4498_p3 = scmp.ne.s32.totalorder %s75_s22, %s4497_s28  ;;  %p4503_p5 = scmp.lt.s32.totalorder %s4497_s28, %s4497_s28 }
  0x14   :  { %p4504_p6 = por %p4503_p5, %p4502_p4 }
  0x16   :  { %p4505_p7 = pnand %p4504_p6, %p4498_p3 }
  0x18   :  { %4508 = shalt.err (!%p4505_p7)
}
  0x19   :  { %s5451_s4 = smov 16   ;;  %s4607_s29 = smov 1  }
  0x1a   :  { %80 = dma.hbm_to_vmem [thread:$0]  %s5443_s16, 32, %s75_s22, [#allocation6], %s5451_s4, %s5451_s4, %s4607_s29  }
  0x1b   :  { %s4608_s21 = smov [#allocation2]   ;;  %s4609_s23 = smov [#allocation7]  }
  0x1c   :  { %s45_s1 = sshll.u32 %s4608_s21, 4  ;;  %s86_s24 = sshll.u32 %s4609_s23, 4  ;;  %s46_s1 = int_to_ptr.vmem [resolvable:$true] %s45_s1  ;;  %s87_s24 = int_to_ptr.vmem [resolvable:$true] %s86_s24 }
  0x1d   :  { %s4509_s3 = scalar_lea.hbm %s5432_s5, 16 }
  0x1e   :  { %p4510_p8 = scmp.ne.s32.totalorder %s5432_s5, %s4509_s3  ;;  %p4513_p9 = scmp.lt.u32.totalorder %s4509_s3, %s5432_s5 }
  0x20   :  { %p4515_p10 = pnand %p4513_p9, %p4510_p8 }
  0x22   :  { %4518 = shalt.err (!%p4515_p10)
}
  0x23   :  { %s4519_s16 = scalar_lea.vmem %s46_s1, 16  ;;  %s4523_s22 = scalar_lea.vmem %s46_s1, 32 }
  0x24   :  { %p4520_p11 = scmp.ne.s32.totalorder %s46_s1, %s4519_s16  ;;  %p4524_p12 = scmp.lt.s32.totalorder %s46_s1, %s46_s1 }
  0x25   :  { %p4525_p13 = scmp.lt.s32.totalorder %s4523_s22, %s4519_s16 }
  0x27   :  { %p4526_p0 = por %p4525_p13, %p4524_p12 }
  0x29   :  { %p4527_p1 = pnand %p4526_p0, %p4520_p11 }
  0x2b   :  { %4530 = shalt.err (!%p4527_p1)
}
  0x2c   :  { %48 = dma.hbm_to_vmem [thread:$0]  %s5432_s5, 16, %s46_s1, [#allocation3]  }
  0x2d   :  { %s4531_s20 = scalar_lea.hbm %s5444_s17, 32 }
  0x2e   :  { %p4532_p2 = scmp.ne.s32.totalorder %s5444_s17, %s4531_s20  ;;  %p4535_p3 = scmp.lt.u32.totalorder %s4531_s20, %s5444_s17 }
  0x30   :  { %p4537_p4 = pnand %p4535_p3, %p4532_p2 }
  0x32   :  { %4540 = shalt.err (!%p4537_p4)
}
  0x33   :  { %s4541_s27 = scalar_lea.vmem %s87_s24, 32  ;;  %p4546_p6 = scmp.lt.s32.totalorder %s87_s24, %s87_s24 }
  0x34   :  { %p4542_p5 = scmp.ne.s32.totalorder %s87_s24, %s4541_s27  ;;  %p4547_p7 = scmp.lt.s32.totalorder %s4541_s27, %s4541_s27 }
  0x36   :  { %p4548_p8 = por %p4547_p7, %p4546_p6 }
  0x38   :  { %p4549_p9 = pnand %p4548_p8, %p4542_p5 }
  0x3a   :  { %4552 = shalt.err (!%p4549_p9)
}
  0x3b   :  { %92 = dma.hbm_to_vmem [thread:$0]  %s5444_s17, 32, %s87_s24, [#allocation6], %s5451_s4, %s5451_s4, %s4607_s29  }
  0x3c   :  { %s4610_s28 = smov [#allocation8]   ;;  %s4553_s0 = scalar_lea.hbm %s5446_s19, 16 }
  0x3d   :  { %s101_s16 = sshll.u32 %s4610_s28, 4  ;;  %p4554_p10 = scmp.ne.s32.totalorder %s5446_s19, %s4553_s0  ;;  %s102_s16 = int_to_ptr.vmem [resolvable:$true] %s101_s16 }
  0x3e   :  { %p4557_p11 = scmp.lt.u32.totalorder %s4553_s0, %s5446_s19 }
  0x40   :  { %p4559_p12 = pnand %p4557_p11, %p4554_p10 }
  0x42   :  { %4562 = shalt.err (!%p4559_p12)
}
  0x43   :  { %s4563_s25 = scalar_lea.vmem %s102_s16, 16  ;;  %s4567_s17 = scalar_lea.vmem %s102_s16, 32 }
  0x44   :  { %p4564_p13 = scmp.ne.s32.totalorder %s102_s16, %s4563_s25  ;;  %p4568_p0 = scmp.lt.s32.totalorder %s102_s16, %s102_s16 }
  0x45   :  { %p4569_p1 = scmp.lt.s32.totalorder %s4567_s17, %s4563_s25 }
  0x47   :  { %p4570_p2 = por %p4569_p1, %p4568_p0 }
  0x49   :  { %p4571_p3 = pnand %p4570_p2, %p4564_p13 }
  0x4b   :  { %4574 = shalt.err (!%p4571_p3)
}
  0x4c   :  { %104 = dma.hbm_to_vmem [thread:$0]  %s5446_s19, 16, %s102_s16, [#allocation9]  }
  0x4d   :  { %4597 = dma.done.wait [#allocation3], 16  }
  0x4e   :  { %4598 = vsyncadd [#allocation3], 4294967280 }
  0x4f   :  { %4599 = dma.done.wait [#allocation6], 64  }
  0x50   :  { %4600 = vsyncadd [#allocation6], 4294967232 }
  0x51   :  { %4601 = dma.done.wait [#allocation9], 16  }
  0x52   :  { %4602 = vsyncadd [#allocation9], 4294967280  ;;  %v4611_v0 = vmov 0   ;;  %s5460_s27 = sld [smem:[#allocation15_spill]]  ;;  %s5461_s28 = sld [smem:[#allocation16_spill]]  ;;  %v4612_v9 = vmov 0.0   ;;  %v120_v16 = vlaneseq }
  0x53   :  { %4364 = vset.pattern.permute.xlu0 %v4611_v0  ;;  %4070 = vmatprep.subr.bf16.mxu1 %v4612_v9  ;;  %vm143_vm0 = vcmask 523264   ;;  %s5463_s19 = sld [smem:[#allocation17_spill]]  ;;  %vm234_vm3 = vcmask 261120   ;;  %v278_v45 = vld [vmem:[%s5433_s6] sm:$0xff]  ;;  %v279_v46 = vld [vmem:[%s5433_s6 + $0x8] sm:$0xff]  ;;  %v280_v47 = vld [vmem:[%s5433_s6 + $0x10] sm:$0xff] }
  0x54   :  { %v121_v17 = vand.u32 127, %v120_v16  ;;  %v227_v22 = vshrl.u32 %v120_v16, 7  ;;  %v283_v48 = vpack.c.bf16 %v279_v46, %v278_v45  ;;  %v281_v49 = vld [vmem:[%s5433_s6 + $0x18] sm:$0xff]  ;;  %vm4613_vm4 = vmmov 0   ;;  %s5464_s3 = sld [smem:[#allocation19_spill]]  ;;  %s4614_s5 = smov 96  }
  0x55   :  { %4074 = vmatprep.mubr.msk.bf16.mxu1 %vm4613_vm4, %v4612_v9  ;;  %v284_v50 = vpack.c.bf16 %v281_v49, %v280_v47  ;;  %v3843_v63 = vld [vmem:[#allocation2] ss:$0 sm:$0xff]  ;;  %vm339_vm5 = vcmask 64512   ;;  %s4615_s1 = smov 64   ;;  %s4617_s22 = smov 120   ;;  %vm1689_vm6 = vcmask 130048  }
  0x56   :  { %v228_v23 = vsub.s32 0, %v227_v22  ;;  %4071 = vmatpush3.bf16.msra.mxu1 %v283_v48  ;;  %s4618_s30 = smov 56   ;;  %s4620_s16 = smov 112   ;;  %vm1692_vm7 = vcmask 195584   ;;  %vm3704_vm8 = vcmask 1040384   ;;  %vm3817_vm11 = vcmask 113664  }
  0x57   :  { %4072 = vmatprep.subr.bf16.mxu1 %v4612_v9  ;;  %s4621_s0 = smov 48   ;;  %s4622_s21 = smov 72   ;;  %vm3819_vm13 = vcmask 123904  }
  0x58   :  { %v118_v1 = vld [vmem:[%s5460_s27] sm:$0xff]  ;;  %v135_v3 = vld [vmem:[%s5461_s28 + $0x8] sm:$0xff]  ;;  %v136_v4 = vld [vmem:[%s5461_s28 + $0x10] sm:$0xff]  ;;  %s4623_s23 = smov 104   ;;  %s4624_s20 = smov 40  }
  0x59   :  { %v134_v2 = vld [vmem:[%s5461_s28] sm:$0xff]  ;;  %123 = vperm.xlu0 %4364, %v118_v1   ;;  %v137_v5 = vld [vmem:[%s5461_s28 + $0x18] sm:$0xff]  ;;  %v119_v6 = vld [vmem:[%s5460_s27 + $0x8] sm:$0xff]  ;;  %s5453_s2 = smov 8   ;;  %s5452_s25 = smov 24  }
  0x5a   :  { %v4313_v7 = vpack.c.bf16 %v135_v3, %v134_v2  ;;  %v4317_v8 = vpack.c.bf16 %v137_v5, %v136_v4  ;;  %v138_v10 = vld [vmem:[%s5461_s28 + $0x20] sm:$0xff]  ;;  %v139_v11 = vld [vmem:[%s5461_s28 + $0x28] sm:$0xff]  ;;  %v140_v13 = vld [vmem:[%s5461_s28 + $0x30] sm:$0xff]  ;;  %4073 = vmatpush3.bf16.msra.mxu1 %v284_v50  ;;  %s4630_s27 = smov 14  }
  0x5b   :  { %v4321_v12 = vpack.c.bf16 %v139_v11, %v138_v10  ;;  %v141_v14 = vld [vmem:[%s5461_s28 + $0x38] sm:$0xff]  ;;  %s5462_s28 = sld [smem:[#allocation18_spill]]  ;;  %v142_v25 = vld [vmem:[%s5463_s19] sm:$0xff]  ;;  %4088 = vmatprep.subr.mxu1 %v4612_v9  ;;  %s4619_s19 = smov 80  }
  0x5c   :  { %4314 = vmatprep.subr.bf16.mxu0 %v4313_v7  ;;  %v4325_v15 = vpack.c.bf16 %v141_v14, %v140_v13  ;;  %v3842_v59 = vld [vmem:[%s5464_s3] ss:$0 sm:$0xff] }
  0x5d   :  { %126 = vperm.xlu0 %4364, %v119_v6   ;;  %4316 = vmatpush3.bf16.msra.mxu0 %v4313_v7  ;;  %v3844_v4 = vld [vmem:[%s5434_s7] ss:$0 sm:$0xff] }
  0x5e   :  { %4318 = vmatprep.subr.bf16.mxu0 %v4317_v8 }
  0x61   :  { %4320 = vmatpush3.bf16.msra.mxu0 %v4317_v8  ;;  %v225_v24 = vld [vmem:[%s5462_s28] sm:$0x3]  ;;  %s4616_s28 = smov 88  }
  0x62   :  { %4322 = vmatprep.subr.bf16.mxu0 %v4321_v12  ;;  %v229_v27 = vrot.slane %v225_v24, %v228_v23 }
  0x65   :  { %4324 = vmatpush3.bf16.msra.mxu0 %v4321_v12 }
  0x66   :  { %4326 = vmatprep.subr.bf16.mxu0 %v4325_v15 }
  0x69   :  { %4328 = vmatpush3.bf16.msra.mxu0 %v4325_v15 }
  0x6a   :  { %4078 = vmatprep.subr.mxu0 %v4612_v9 }
  0xd8   :  { %v124_v18 = vpop.permute.xlu0 %123 }
  0xd9   :  { %vm128_vm1 = vcmp.eq.s32.totalorder %v121_v17, %v124_v18 }
  0xda   :  { %v3838_v19 = vsel %vm128_vm1, 1.0, %v4612_v9 }
  0xdb   :  { %4067 = vmatprep.mubr.msk.f32.mxu0 %vm143_vm0, %v3838_v19 }
  0xdc   :  { %v127_v20 = vpop.permute.xlu0 %126 }
  0xdd   :  { %vm129_vm2 = vcmp.eq.s32.totalorder %v121_v17, %v127_v20 }
  0xde   :  { %v3839_v21 = vsel %vm129_vm2, 1.0, %v4612_v9 }
  0xdf   :  { %4068 = vmatmul.mubr.msk.f32.vlgmr.msra.gmra.mrb[0].mxu0 %vm143_vm0, %v3839_v21 }
  0xe0   :  { %4080 = vmatprep.mubr.msk.f32.mxu0 %vm4613_vm4, %v4612_v9 }
 0x1b2   :  { %v4069_v26 = vpop.f32.mrb[0].mxu0 }
 0x1b3   :  { %v216_v28 = vpop.f32.mrb[1].mxu0  ;;  %v222_v29 = vadd.f32 %v4069_v26, %v142_v25 }
 0x1b4   :  { %v217_v30 = vadd.f32 %v216_v28, %v142_v25 }
 0x1b5   :  { %v231_v33 = vadd.f32 %v229_v27, %v222_v29 }
 0x1b6   :  { %v230_v31 = vadd.f32 %v229_v27, %v217_v30 }
 0x1b7   :  { %v238_v34 = vsel %vm234_vm3, %v231_v33, 0.0 }
 0x1b8   :  { %v235_v32 = vsel %vm234_vm3, %v230_v31, 0.0 }
 0x1b9   :  { %236 = vadd.xlane.f32.xlu1 %v235_v32 }
 0x1bd   :  { %239 = vadd.xlane.f32.xlu1 %v238_v34 }
 0x246   :  { %v237_v35 = vpop.xlane.xlu1 %236 }
 0x247   :  { %v242_v36 = vmul.f32 0.03125, %v237_v35 }
 0x249   :  { %v244_v37 = vsub.f32 %v230_v31, %v242_v36 }
 0x24a   :  { %v240_v38 = vpop.xlane.xlu1 %239 }
 0x24b   :  { %v243_v39 = vmul.f32 0.03125, %v240_v38  ;;  %v246_v40 = vmul.f32 %v244_v37, %v244_v37 }
 0x24d   :  { %v245_v41 = vsub.f32 %v231_v33, %v243_v39  ;;  %v248_v42 = vsel %vm234_vm3, %v246_v40, 0.0 }
 0x24e   :  { %249 = vadd.xlane.f32.xlu0 %v248_v42 }
 0x24f   :  { %v247_v43 = vmul.f32 %v245_v41, %v245_v41 }
 0x251   :  { %v251_v44 = vsel %vm234_vm3, %v247_v43, 0.0 }
 0x252   :  { %252 = vadd.xlane.f32.xlu1 %v251_v44 }
 0x2db   :  { %v250_v51 = vpop.xlane.xlu0 %249 }
 0x2dc   :  { %v254_v52 = vmul.f32 0.03125, %v250_v51 }
 0x2de   :  { %v256_v53 = vadd.f32 1e-12, %v254_v52 }
 0x2df   :  { %v253_v54 = vpop.xlane.xlu1 %252 }
 0x2e0   :  { %4395 = vrsqrt.f32 %v256_v53  ;;  %v255_v55 = vmul.f32 0.03125, %v253_v54 }
 0x2e2   :  { %v257_v56 = vadd.f32 1e-12, %v255_v55 }
 0x2e4   :  { %4397 = vrsqrt.f32 %v257_v56 }
 0x2ea   :  { %v4396_v57 = vpop.eup %4395 }
 0x2eb   :  { %v260_v58 = vmul.f32 %v4396_v57, %v244_v37 }
 0x2ed   :  { %v268_v62 = vmul.f32 %v3842_v59, %v260_v58 }
 0x2ee   :  { %v4398_v60 = vpop.eup %4397 }
 0x2ef   :  { %v261_v61 = vmul.f32 %v4398_v60, %v245_v41  ;;  %v4860_v1 = vadd.f32 %v3843_v63, %v268_v62 }
 0x2f1   :  { %v269_v0 = vmul.f32 %v3842_v59, %v261_v61 }
 0x2f3   :  { %v4862_v2 = vadd.f32 %v3843_v63, %v269_v0 }
 0x2f5   :  { %v282_v3 = vpack.c.bf16 %v4862_v2, %v4860_v1 }
 0x2f7   :  { %4075 = vmatmul.mubr.msk.bf16.vlgmr.msra.gmra.mrb[0].mxu1 %vm234_vm3, %v282_v3 }
 0x2f8   :  { %4090 = vmatprep.mubr.msk.f32.mxu1 %vm4613_vm4, %v4612_v9 }
 0x3ca   :  { %v329_v5 = vpop.f32.mrb[0].mxu1 }
 0x3cb   :  { %v4872_v6 = vadd.f32 %v3844_v4, %v329_v5  ;;  %v4076_v7 = vpop.f32.mrb[1].mxu1 }
 0x3cc   :  { %v332_v8 = vpop.f32.mrb[2].mxu1 }
 0x3cd   :  { %337 = vrot.lane.b32.xlu1 %v4872_v6, %s4614_s5  ;;  %v4077_v10 = vpop.f32.mrb[3].mxu1  ;;  %v4876_v11 = vadd.f32 %v3844_v4, %v332_v8 }
 0x3d1   :  { %415 = vrot.lane.b32.xlu1 %v4876_v11, %s4614_s5 }
 0x43f   :  { %v338_v12 = vpop.permute.xlu1 %337 }
 0x440   :  { %4079 = vmatpush3.xpose.msk.msra.mxu0 %vm339_vm5, %v338_v12 }
 0x441   :  { %4083 = vmatprep.subr.mxu0 %v4612_v9 }
 0x443   :  { %4081 = vmatmul.mubr.msk.f32.vlgmr.msra.gmra.mrb[2].mxu0 %vm339_vm5, %v4872_v6  ;;  %v416_v13 = vpop.permute.xlu1 %415 }
 0x444   :  { %4084 = vmatpush3.xpose.msk.msra.mxu0 %vm339_vm5, %v416_v13  ;;  %4085 = vmatprep.mubr.msk.f32.mxu0 %vm4613_vm4, %v4612_v9 }
 0x445   :  { %4093 = vmatprep.subr.mxu0 %v4612_v9 }
 0x447   :  { %4086 = vmatmul.mubr.msk.f32.vlgmr.msra.gmra.mrb[4].mxu0 %vm339_vm5, %v4876_v11 }
 0x448   :  { %4095 = vmatprep.mubr.msk.f32.mxu0 %vm4613_vm4, %v4612_v9 }
 0x516   :  { %v410_v14 = vpop.f32.mrb[2].mxu0 }
 0x517   :  { %v491_v15 = vmul.f32 0.35355338, %v410_v14  ;;  %v4082_v16 = vpop.f32.mrb[3].mxu0 }
 0x519   :  { %v493_v17 = vsel %vm339_vm5, %v491_v15, -inf }
 0x51a   :  { %494 = vmax.xlane.f32.xlu1 %v493_v17  ;;  %v487_v18 = vpop.f32.mrb[4].mxu0 }
 0x51b   :  { %v492_v19 = vmul.f32 0.35355338, %v487_v18  ;;  %v4087_v20 = vpop.f32.mrb[5].mxu0 }
 0x51d   :  { %v496_v21 = vsel %vm339_vm5, %v492_v19, -inf }
 0x51e   :  { %497 = vmax.xlane.f32.xlu0 %v496_v21 }
 0x52b   :  { %591 = vrot.lane.b32.xlu1 %v4876_v11, %s4615_s1 }
 0x534   :  { %515 = vrot.lane.b32.xlu0 %v4872_v6, %s4615_s1 }
 0x538   :  { %669 = vrot.lane.b32.xlu0 %v4872_v6, %s4616_s28 }
 0x53c   :  { %747 = vrot.lane.b32.xlu0 %v4876_v11, %s4616_s28 }
 0x540   :  { %667 = vrot.lane.b32.xlu0 %v4872_v6, %s4617_s22 }
 0x5a7   :  { %v495_v22 = vpop.xlane.xlu1 %494 }
 0x5a8   :  { %v499_v23 = vsub.f32 %v491_v15, %v495_v22 }
 0x5aa   :  { %v501_v24 = vmul.f32 1.442695, %v499_v23 }
 0x5ab   :  { %v498_v25 = vpop.xlane.xlu0 %497  ;;  %v592_v26 = vpop.permute.xlu1 %591 }
 0x5ac   :  { %4399 = vpow2.f32 %v501_v24  ;;  %v500_v27 = vsub.f32 %v492_v19, %v498_v25  ;;  %4094 = vmatpush3.msra.mxu0 %v592_v26 }
 0x5ad   :  { %4103 = vmatprep.subr.mxu0 %v4612_v9 }
 0x5ae   :  { %v503_v28 = vmul.f32 1.442695, %v500_v27 }
 0x5af   :  { %v516_v29 = vpop.permute.xlu0 %515 }
 0x5b0   :  { %4401 = vpow2.f32 %v503_v28  ;;  %4089 = vmatpush3.msra.mxu1 %v516_v29 }
 0x5b1   :  { %4098 = vmatprep.subr.mxu1 %v4612_v9 }
 0x5b3   :  { %v670_v34 = vpop.permute.xlu0 %669 }
 0x5b6   :  { %v4400_v30 = vpop.eup %4399 }
 0x5b7   :  { %v505_v31 = vsel %vm339_vm5, %v4400_v30, 0.0  ;;  %v748_v35 = vpop.permute.xlu0 %747 }
 0x5b8   :  { %506 = vadd.xlane.f32.xlu0 %v505_v31 }
 0x5ba   :  { %v4402_v32 = vpop.eup %4401 }
 0x5bb   :  { %v508_v33 = vsel %vm339_vm5, %v4402_v32, 0.0  ;;  %v668_v36 = vpop.permute.xlu0 %667 }
 0x5bc   :  { %509 = vadd.xlane.f32.xlu0 %v508_v33 }
 0x5d2   :  { %745 = vrot.lane.b32.xlu0 %v4876_v11, %s4617_s22 }
 0x645   :  { %v507_v37 = vpop.xlane.xlu0 %506 }
 0x646   :  { %4403 = vrcp.f32 %v507_v37 }
 0x649   :  { %v510_v38 = vpop.xlane.xlu0 %509 }
 0x64a   :  { %4405 = vrcp.f32 %v510_v38 }
 0x64d   :  { %v746_v43 = vpop.permute.xlu0 %745 }
 0x650   :  { %v4404_v39 = vpop.eup %4403 }
 0x651   :  { %v513_v40 = vmul.f32 %v4404_v39, %v4400_v30 }
 0x653   :  { %4091 = vmatmul.mubr.msk.f32.vlgmr.msra.gmra.mrb[4].mxu1 %vm339_vm5, %v513_v40 }
 0x654   :  { %v4406_v41 = vpop.eup %4405  ;;  %4099 = vmatpush3.xpose.msk.msra.mxu1 %vm339_vm5, %v670_v34  ;;  %4100 = vmatprep.mubr.msk.f32.mxu1 %vm4613_vm4, %v4612_v9 }
 0x655   :  { %v514_v42 = vmul.f32 %v4406_v41, %v4402_v32  ;;  %4108 = vmatprep.subr.mxu1 %v4612_v9 }
 0x657   :  { %4096 = vmatmul.mubr.msk.f32.vlgmr.msra.gmra.mrb[6].mxu0 %vm339_vm5, %v514_v42  ;;  %4101 = vmatmul.mubr.msk.f32.vlgmr.msra.gmra.mrb[6].mxu1 %vm339_vm5, %v668_v36 }
 0x658   :  { %4104 = vmatpush3.xpose.msk.msra.mxu0 %vm339_vm5, %v748_v35  ;;  %4105 = vmatprep.mubr.msk.f32.mxu0 %vm4613_vm4, %v4612_v9 }
 0x659   :  { %4113 = vmatprep.subr.mxu0 %v4612_v9  ;;  %4110 = vmatprep.mubr.msk.f32.mxu1 %vm4613_vm4, %v4612_v9 }
 0x65b   :  { %4106 = vmatmul.mubr.msk.f32.vlgmr.msra.gmra.mrb[8].mxu0 %vm339_vm5, %v746_v43 }
 0x65c   :  { %4115 = vmatprep.mubr.msk.f32.mxu0 %vm4613_vm4, %v4612_v9 }
 0x726   :  { %v4926_v44 = vpop.f32.mrb[4].mxu1 }
 0x727   :  { %v4092_v45 = vpop.f32.mrb[5].mxu1 }
 0x72a   :  { %v4928_v46 = vpop.f32.mrb[6].mxu0  ;;  %v741_v47 = vpop.f32.mrb[6].mxu1 }
 0x72b   :  { %v823_v48 = vmul.f32 0.35355338, %v741_v47  ;;  %v4097_v49 = vpop.f32.mrb[7].mxu0  ;;  %v4102_v50 = vpop.f32.mrb[7].mxu1 }
 0x72d   :  { %v825_v51 = vsel %vm339_vm5, %v823_v48, -inf }
 0x72e   :  { %v819_v52 = vpop.f32.mrb[8].mxu0  ;;  %826 = vmax.xlane.f32.xlu1 %v825_v51 }
 0x72f   :  { %v824_v53 = vmul.f32 0.35355338, %v819_v52  ;;  %v4107_v54 = vpop.f32.mrb[9].mxu0 }
 0x731   :  { %v828_v55 = vsel %vm339_vm5, %v824_v53, -inf }
 0x732   :  { %829 = vmax.xlane.f32.xlu0 %v828_v55 }
 0x73f   :  { %923 = vrot.lane.b32.xlu1 %v4876_v11, %s4618_s30 }
 0x743   :  { %1001 = vrot.lane.b32.xlu1 %v4872_v6, %s4619_s19 }
 0x748   :  { %847 = vrot.lane.b32.xlu0 %v4872_v6, %s4618_s30 }
 0x74c   :  { %1079 = vrot.lane.b32.xlu0 %v4876_v11, %s4619_s19 }
 0x7bb   :  { %v827_v56 = vpop.xlane.xlu1 %826 }
 0x7bc   :  { %v831_v57 = vsub.f32 %v823_v48, %v827_v56 }
 0x7be   :  { %v833_v58 = vmul.f32 1.442695, %v831_v57 }
 0x7bf   :  { %v830_v59 = vpop.xlane.xlu0 %829  ;;  %v924_v60 = vpop.permute.xlu1 %923 }
 0x7c0   :  { %4407 = vpow2.f32 %v833_v58  ;;  %v832_v61 = vsub.f32 %v824_v53, %v830_v59  ;;  %4114 = vmatpush3.msra.mxu0 %v924_v60 }
 0x7c1   :  { %4123 = vmatprep.subr.mxu0 %v4612_v9 }
 0x7c2   :  { %v835_v62 = vmul.f32 1.442695, %v832_v61 }
 0x7c3   :  { %v848_v63 = vpop.permute.xlu0 %847  ;;  %v1002_v8 = vpop.permute.xlu1 %1001 }
 0x7c4   :  { %4409 = vpow2.f32 %v835_v62  ;;  %4109 = vmatpush3.msra.mxu1 %v848_v63 }
 0x7c5   :  { %4118 = vmatprep.subr.mxu1 %v4612_v9 }
 0x7c7   :  { %v1080_v7 = vpop.permute.xlu0 %1079 }
 0x7ca   :  { %v4408_v0 = vpop.eup %4407 }
 0x7cb   :  { %v837_v3 = vsel %vm339_vm5, %v4408_v0, 0.0 }
 0x7cc   :  { %838 = vadd.xlane.f32.xlu0 %v837_v3 }
 0x7ce   :  { %v4410_v4 = vpop.eup %4409 }
 0x7cf   :  { %v840_v5 = vsel %vm339_vm5, %v4410_v4, 0.0 }
 0x7d0   :  { %841 = vadd.xlane.f32.xlu1 %v840_v5 }
 0x7e1   :  { %999 = vrot.lane.b32.xlu1 %v4872_v6, %s4620_s16 }
 0x7e2   :  { %1077 = vrot.lane.b32.xlu0 %v4876_v11, %s4620_s16 }
 0x859   :  { %v839_v10 = vpop.xlane.xlu0 %838 }
 0x85a   :  { %4411 = vrcp.f32 %v839_v10 }
 0x85d   :  { %v842_v12 = vpop.xlane.xlu1 %841  ;;  %v1078_v18 = vpop.permute.xlu0 %1077 }
 0x85e   :  { %4413 = vrcp.f32 %v842_v12 }
 0x861   :  { %v1000_v17 = vpop.permute.xlu1 %999 }
 0x864   :  { %v4412_v13 = vpop.eup %4411 }
 0x865   :  { %v845_v14 = vmul.f32 %v4412_v13, %v4408_v0 }
 0x867   :  { %4111 = vmatmul.mubr.msk.f32.vlgmr.msra.gmra.mrb[8].mxu1 %vm339_vm5, %v845_v14 }
 0x868   :  { %v4414_v15 = vpop.eup %4413  ;;  %4119 = vmatpush3.xpose.msk.msra.mxu1 %vm339_vm5, %v1002_v8  ;;  %4120 = vmatprep.mubr.msk.f32.mxu1 %vm4613_vm4, %v4612_v9 }
 0x869   :  { %v846_v16 = vmul.f32 %v4414_v15, %v4410_v4  ;;  %4128 = vmatprep.subr.mxu1 %v4612_v9 }
 0x86b   :  { %4116 = vmatmul.mubr.msk.f32.vlgmr.msra.gmra.mrb[10].mxu0 %vm339_vm5, %v846_v16  ;;  %4121 = vmatmul.mubr.msk.f32.vlgmr.msra.gmra.mrb[10].mxu1 %vm339_vm5, %v1000_v17 }
 0x86c   :  { %4124 = vmatpush3.xpose.msk.msra.mxu0 %vm339_vm5, %v1080_v7  ;;  %4125 = vmatprep.mubr.msk.f32.mxu0 %vm4613_vm4, %v4612_v9 }
 0x86d   :  { %4133 = vmatprep.subr.mxu0 %v4612_v9  ;;  %4130 = vmatprep.mubr.msk.f32.mxu1 %vm4613_vm4, %v4612_v9 }
 0x86f   :  { %4126 = vmatmul.mubr.msk.f32.vlgmr.msra.gmra.mrb[12].mxu0 %vm339_vm5, %v1078_v18 }
 0x870   :  { %4135 = vmatprep.mubr.msk.f32.mxu0 %vm4613_vm4, %v4612_v9 }
 0x93a   :  { %v4964_v19 = vpop.f32.mrb[8].mxu1 }
 0x93b   :  { %v4112_v20 = vpop.f32.mrb[9].mxu1 }
 0x93e   :  { %v4966_v21 = vpop.f32.mrb[10].mxu0  ;;  %v1073_v22 = vpop.f32.mrb[10].mxu1 }
 0x93f   :  { %v4365_v23 = vpack.i.bf16 %v4966_v21, %v4964_v19  ;;  %v1155_v24 = vmul.f32 0.35355338, %v1073_v22  ;;  %v4117_v25 = vpop.f32.mrb[11].mxu0  ;;  %v4122_v26 = vpop.f32.mrb[11].mxu1 }
 0x941   :  { %v1157_v27 = vsel %vm339_vm5, %v1155_v24, -inf }
 0x942   :  { %v1151_v28 = vpop.f32.mrb[12].mxu0  ;;  %1158 = vmax.xlane.f32.xlu1 %v1157_v27  ;;  %v1696_v27 = vld [vmem:[%s5435_s8 + $0x8] sm:$0xff] }
 0x943   :  { %v1156_v29 = vmul.f32 0.35355338, %v1151_v28  ;;  %v4127_v30 = vpop.f32.mrb[13].mxu0 }
 0x944   :  { %v1698_v30 = vld [vmem:[%s5435_s8 + $0x18] sm:$0xff] }
 0x945   :  { %v1160_v31 = vsel %vm339_vm5, %v1156_v29, -inf }
 0x946   :  { %1161 = vmax.xlane.f32.xlu0 %v1160_v31 }
 0x953   :  { %1255 = vrot.lane.b32.xlu1 %v4876_v11, %s4621_s0 }
 0x957   :  { %1333 = vrot.lane.b32.xlu1 %v4872_v6, %s4622_s21 }
 0x95c   :  { %1179 = vrot.lane.b32.xlu0 %v4872_v6, %s4621_s0 }
 0x960   :  { %1411 = vrot.lane.b32.xlu0 %v4876_v11, %s4622_s21 }
 0x9cf   :  { %v1159_v32 = vpop.xlane.xlu1 %1158 }
 0x9d0   :  { %v1163_v33 = vsub.f32 %v1155_v24, %v1159_v32 }
 0x9d2   :  { %v1165_v34 = vmul.f32 1.442695, %v1163_v33 }
 0x9d3   :  { %v1162_v35 = vpop.xlane.xlu0 %1161  ;;  %v1256_v36 = vpop.permute.xlu1 %1255 }
 0x9d4   :  { %4415 = vpow2.f32 %v1165_v34  ;;  %v1164_v37 = vsub.f32 %v1156_v29, %v1162_v35  ;;  %4134 = vmatpush3.msra.mxu0 %v1256_v36  ;;  %v1697_v29 = vld [vmem:[%s5435_s8 + $0x10] sm:$0xff] }
 0x9d5   :  { %4143 = vmatprep.subr.mxu0 %v4612_v9  ;;  %v1701_v31 = vpack.c.bf16 %v1698_v30, %v1697_v29  ;;  %v3873_v29 = vld [vmem:[%s5438_s11] ss:$0 sm:$0xff] }
 0x9d6   :  { %v1167_v38 = vmul.f32 1.442695, %v1164_v37 }
 0x9d7   :  { %v1180_v39 = vpop.permute.xlu0 %1179  ;;  %v1334_v47 = vpop.permute.xlu1 %1333 }
 0x9d8   :  { %4417 = vpow2.f32 %v1167_v38  ;;  %4129 = vmatpush3.msra.mxu1 %v1180_v39 }
 0x9d9   :  { %4138 = vmatprep.subr.mxu1 %v4612_v9 }
 0x9db   :  { %v1412_v45 = vpop.permute.xlu0 %1411 }
 0x9de   :  { %v4416_v40 = vpop.eup %4415 }
 0x9df   :  { %v1169_v41 = vsel %vm339_vm5, %v4416_v40, 0.0 }
 0x9e0   :  { %1170 = vadd.xlane.f32.xlu0 %v1169_v41 }
 0x9e2   :  { %v4418_v42 = vpop.eup %4417 }
 0x9e3   :  { %v1172_v43 = vsel %vm339_vm5, %v4418_v42, 0.0 }
 0x9e4   :  { %1173 = vadd.xlane.f32.xlu1 %v1172_v43 }
 0x9f5   :  { %1331 = vrot.lane.b32.xlu1 %v4872_v6, %s4623_s23 }
 0x9f6   :  { %1409 = vrot.lane.b32.xlu0 %v4876_v11, %s4623_s23 }
 0xa6d   :  { %v1171_v48 = vpop.xlane.xlu0 %1170 }
 0xa6e   :  { %4419 = vrcp.f32 %v1171_v48 }
 0xa71   :  { %v1174_v49 = vpop.xlane.xlu1 %1173  ;;  %v1410_v55 = vpop.permute.xlu0 %1409 }
 0xa72   :  { %4421 = vrcp.f32 %v1174_v49 }
 0xa75   :  { %v1332_v54 = vpop.permute.xlu1 %1331 }
 0xa78   :  { %v4420_v50 = vpop.eup %4419 }
 0xa79   :  { %v1177_v51 = vmul.f32 %v4420_v50, %v4416_v40 }
 0xa7b   :  { %4131 = vmatmul.mubr.msk.f32.vlgmr.msra.gmra.mrb[12].mxu1 %vm339_vm5, %v1177_v51 }
 0xa7c   :  { %v4422_v52 = vpop.eup %4421  ;;  %4139 = vmatpush3.xpose.msk.msra.mxu1 %vm339_vm5, %v1334_v47  ;;  %4140 = vmatprep.mubr.msk.f32.mxu1 %vm4613_vm4, %v4612_v9 }
 0xa7d   :  { %v1178_v53 = vmul.f32 %v4422_v52, %v4418_v42  ;;  %4148 = vmatprep.subr.mxu1 %v4612_v9 }
 0xa7f   :  { %4136 = vmatmul.mubr.msk.f32.vlgmr.msra.gmra.mrb[14].mxu0 %vm339_vm5, %v1178_v53  ;;  %4141 = vmatmul.mubr.msk.f32.vlgmr.msra.gmra.mrb[14].mxu1 %vm339_vm5, %v1332_v54 }
 0xa80   :  { %4144 = vmatpush3.xpose.msk.msra.mxu0 %vm339_vm5, %v1412_v45  ;;  %4145 = vmatprep.mubr.msk.f32.mxu0 %vm4613_vm4, %v4612_v9 }
 0xa81   :  { %4153 = vmatprep.subr.mxu0 %v4612_v9  ;;  %4150 = vmatprep.mubr.msk.f32.mxu1 %vm4613_vm4, %v4612_v9 }
 0xa83   :  { %4146 = vmatmul.mubr.msk.f32.vlgmr.msra.gmra.mrb[16].mxu0 %vm339_vm5, %v1410_v55 }
 0xa84   :  { %4155 = vmatprep.mubr.msk.f32.mxu0 %vm4613_vm4, %v4612_v9 }
 0xb4e   :  { %v1251_v56 = vpop.f32.mrb[12].mxu1 }
 0xb4f   :  { %v4132_v57 = vpop.f32.mrb[13].mxu1 }
 0xb52   :  { %v1327_v58 = vpop.f32.mrb[14].mxu0  ;;  %v1405_v59 = vpop.f32.mrb[14].mxu1 }
 0xb53   :  { %v4370_v60 = vpack.i.bf16 %v1327_v58, %v1251_v56  ;;  %v1487_v61 = vmul.f32 0.35355338, %v1405_v59  ;;  %v4137_v62 = vpop.f32.mrb[15].mxu0  ;;  %v4142_v63 = vpop.f32.mrb[15].mxu1 }
 0xb55   :  { %v1489_v0 = vsel %vm339_vm5, %v1487_v61, -inf }
 0xb56   :  { %v1483_v3 = vpop.f32.mrb[16].mxu0  ;;  %1490 = vmax.xlane.f32.xlu1 %v1489_v0 }
 0xb57   :  { %v1488_v4 = vmul.f32 0.35355338, %v1483_v3  ;;  %v4147_v5 = vpop.f32.mrb[17].mxu0 }
 0xb59   :  { %v1492_v7 = vsel %vm339_vm5, %v1488_v4, -inf }
 0xb5a   :  { %1493 = vmax.xlane.f32.xlu0 %v1492_v7 }
 0xbe3   :  { %v1491_v8 = vpop.xlane.xlu1 %1490 }
 0xbe4   :  { %v1495_v10 = vsub.f32 %v1487_v61, %v1491_v8 }
 0xbe6   :  { %v1497_v12 = vmul.f32 1.442695, %v1495_v10 }
 0xbe7   :  { %v1494_v13 = vpop.xlane.xlu0 %1493 }
 0xbe8   :  { %4423 = vpow2.f32 %v1497_v12  ;;  %v1496_v14 = vsub.f32 %v1488_v4, %v1494_v13 }
 0xbea   :  { %v1499_v15 = vmul.f32 1.442695, %v1496_v14  ;;  %v1800_v14 = vld [vmem:[%s5439_s12 + $0x8] sm:$0xff] }
 0xbec   :  { %4425 = vpow2.f32 %v1499_v15 }
 0xbf2   :  { %v4424_v16 = vpop.eup %4423 }
 0xbf3   :  { %v1501_v17 = vsel %vm339_vm5, %v4424_v16, 0.0 }
 0xbf4   :  { %1502 = vadd.xlane.f32.xlu0 %v1501_v17  ;;  %v1802_v17 = vld [vmem:[%s5439_s12 + $0x18] sm:$0xff] }
 0xbf6   :  { %v4426_v18 = vpop.eup %4425 }
 0xbf7   :  { %v1504_v20 = vsel %vm339_vm5, %v4426_v18, 0.0 }
 0xbf8   :  { %1505 = vadd.xlane.f32.xlu1 %v1504_v20 }
 0xc09   :  { %1587 = vrot.lane.b32.xlu1 %v4876_v11, %s4624_s20 }
 0xc0a   :  { %1511 = vrot.lane.b32.xlu0 %v4872_v6, %s4624_s20 }
 0xc0d   :  { %4366 = vrot.lane.b32.xlu1 %v4365_v23, %s5453_s2  ;;  %v1695_v23 = vld [vmem:[%s5435_s8] sm:$0xff] }
 0xc0e   :  { %4371 = vrot.lane.b32.xlu0 %v4370_v60, %s5451_s4  ;;  %v1700_v28 = vpack.c.bf16 %v1696_v27, %v1695_v23 }
 0xc81   :  { %v1503_v22 = vpop.xlane.xlu0 %1502 }
 0xc82   :  { %4427 = vrcp.f32 %v1503_v22 }
 0xc85   :  { %v1512_v24 = vpop.permute.xlu0 %1511  ;;  %v1506_v25 = vpop.xlane.xlu1 %1505 }
 0xc86   :  { %4429 = vrcp.f32 %v1506_v25  ;;  %4149 = vmatpush3.msra.mxu1 %v1512_v24 }
 0xc87   :  { %4158 = vmatprep.subr.bf16.mxu1 %v4612_v9 }
 0xc89   :  { %v1588_v11 = vpop.permute.xlu1 %1587  ;;  %v4372_v40 = vpop.permute.xlu0 %4371 }
 0xc8a   :  { %4154 = vmatpush3.msra.mxu0 %v1588_v11  ;;  %v4374_v43 = vunpack.i.h.bf16 %v4372_v40  ;;  %v4373_v45 = vunpack.i.l.bf16 %v4372_v40  ;;  %v1879_v40 = vld [vmem:[%s5441_s14 + $0x20] sm:$0xff] }
 0xc8b   :  { %4166 = vmatprep.subr.bf16.mxu0 %v4612_v9 }
 0xc8c   :  { %v4428_v6 = vpop.eup %4427 }
 0xc8d   :  { %v1509_v26 = vmul.f32 %v4428_v6, %v4424_v16  ;;  %v4367_v37 = vpop.permute.xlu1 %4366  ;;  %v1801_v16 = vld [vmem:[%s5439_s12 + $0x10] sm:$0xff] }
 0xc8e   :  { %v4369_v38 = vunpack.i.h.bf16 %v4367_v37  ;;  %v4368_v39 = vunpack.i.l.bf16 %v4367_v37 }
 0xc8f   :  { %4151 = vmatmul.mubr.msk.f32.vlgmr.msra.gmra.mrb[16].mxu1 %vm339_vm5, %v1509_v26 }
 0xc90   :  { %v4430_v19 = vpop.eup %4429  ;;  %4162 = vmatprep.mubr.msk.bf16.mxu1 %vm4613_vm4, %v4612_v9  ;;  %4159 = vmatpush3.bf16.msra.mxu1 %v1700_v28  ;;  %v1688_v41 = vsel %vm339_vm5, %v4928_v46, %v4369_v38  ;;  %v1687_v42 = vsel %vm339_vm5, %v4926_v44, %v4368_v39  ;;  %v3870_v44 = vld [vmem:[%s5436_s9] ss:$0 sm:$0xff]  ;;  %v1878_v38 = vld [vmem:[%s5441_s14 + $0x18] sm:$0xff] }
 0xc91   :  { %v1510_v21 = vmul.f32 %v4430_v19, %v4426_v18  ;;  %4160 = vmatprep.subr.bf16.mxu1 %v4612_v9  ;;  %v1690_v50 = vsel %vm1689_vm6, %v1687_v42, %v4373_v45  ;;  %v1691_v51 = vsel %vm1689_vm6, %v1688_v41, %v4374_v43  ;;  %v1805_v18 = vpack.c.bf16 %v1802_v17, %v1801_v16  ;;  %v1880_v41 = vld [vmem:[%s5441_s14 + $0x28] sm:$0xff]  ;;  %v1881_v43 = vld [vmem:[%s5441_s14 + $0x30] sm:$0xff]  ;;  %v1882_v45 = vld [vmem:[%s5441_s14 + $0x38] sm:$0xff] }
 0xc92   :  { %v1886_v42 = vpack.c.bf16 %v1880_v41, %v1879_v40 }
 0xc93   :  { %4156 = vmatmul.mubr.msk.f32.vlgmr.msra.gmra.mrb[18].mxu0 %vm339_vm5, %v1510_v21  ;;  %v3872_v21 = vld [vmem:[%s5437_s10] ss:$0 sm:$0xff] }
 0xc94   :  { %4170 = vmatprep.mubr.msk.bf16.mxu0 %vm4613_vm4, %v4612_v9  ;;  %4161 = vmatpush3.bf16.msra.mxu1 %v1701_v31 }
 0xc95   :  { %4174 = vmatprep.subr.bf16.mxu1 %v4612_v9 }
 0xd62   :  { %v1583_v32 = vpop.f32.mrb[16].mxu1 }
 0xd63   :  { %v4152_v33 = vpop.f32.mrb[17].mxu1 }
 0xd66   :  { %v1659_v34 = vpop.f32.mrb[18].mxu0 }
 0xd67   :  { %v4375_v35 = vpack.i.bf16 %v1659_v34, %v1583_v32  ;;  %v4157_v36 = vpop.f32.mrb[19].mxu0  ;;  %v1875_v34 = vld [vmem:[%s5441_s14] sm:$0xff] }
 0xd68   :  { %v1877_v36 = vld [vmem:[%s5441_s14 + $0x10] sm:$0xff] }
 0xd69   :  { %4376 = vrot.lane.b32.xlu1 %v4375_v35, %s5452_s25  ;;  %v1876_v35 = vld [vmem:[%s5441_s14 + $0x8] sm:$0xff]  ;;  %v1885_v39 = vpack.c.bf16 %v1878_v38, %v1877_v36 }
 0xd6a   :  { %v1884_v37 = vpack.c.bf16 %v1876_v35, %v1875_v34  ;;  %v3883_v34 = vld [vmem:[%s5433_s6 + $0x38] sm:$0xff] }
 0xddb   :  { %v4377_v47 = vpop.permute.xlu1 %4376 }
 0xddc   :  { %v4379_v48 = vunpack.i.h.bf16 %v4377_v47  ;;  %v4378_v49 = vunpack.i.l.bf16 %v4377_v47  ;;  %v1887_v47 = vpack.c.bf16 %v1882_v45, %v1881_v43  ;;  %v3878_v43 = vld [vmem:[#allocation5] ss:$0 sm:$0xff] }
 0xdde   :  { %v1694_v52 = vsel %vm1692_vm7, %v1691_v51, %v4379_v48  ;;  %v1693_v53 = vsel %vm1692_vm7, %v1690_v50, %v4378_v49  ;;  %v3874_v48 = vld [vmem:[%s5440_s13] ss:$0 sm:$0xff] }
 0xddf   :  { %v1699_v54 = vpack.c.bf16 %v1694_v52, %v1693_v53 }
 0xde1   :  { %4163 = vmatmul.mubr.msk.bf16.vlgmr.msra.gmra.mrb[20].mxu1 %vm234_vm3, %v1699_v54 }
 0xde2   :  { %4182 = vmatprep.mubr.msk.bf16.mxu1 %vm4613_vm4, %v4612_v9  ;;  %4175 = vmatpush3.bf16.msra.mxu1 %v1884_v37 }
 0xde3   :  { %4176 = vmatprep.subr.bf16.mxu1 %v4612_v9 }
 0xde6   :  { %4177 = vmatpush3.bf16.msra.mxu1 %v1885_v39 }
 0xde7   :  { %4178 = vmatprep.subr.bf16.mxu1 %v4612_v9 }
 0xdea   :  { %4179 = vmatpush3.bf16.msra.mxu1 %v1886_v42 }
 0xdeb   :  { %4180 = vmatprep.subr.bf16.mxu1 %v4612_v9 }
 0xdee   :  { %4181 = vmatpush3.bf16.msra.mxu1 %v1887_v47 }
 0xdef   :  { %4204 = vmatprep.subr.mxu1 %v4612_v9 }
 0xeb4   :  { %v1746_v46 = vpop.f32.mrb[20].mxu1 }
 0xeb5   :  { %v1747_v55 = vadd.f32 %v3870_v44, %v1746_v46  ;;  %v4164_v56 = vpop.f32.mrb[21].mxu1 }
 0xeb6   :  { %v1749_v57 = vpop.f32.mrb[22].mxu1 }
 0xeb7   :  { %v1750_v58 = vadd.f32 %v3870_v44, %v1749_v57  ;;  %v4165_v59 = vpop.f32.mrb[23].mxu1  ;;  %v1753_v60 = vadd.f32 %v1747_v55, %v4860_v1 }
 0xeb9   :  { %v1757_v61 = vsel %vm234_vm3, %v1753_v60, 0.0  ;;  %v1754_v62 = vadd.f32 %v1750_v58, %v4862_v2  ;;  %v1799_v2 = vld [vmem:[%s5439_s12] sm:$0xff] }
 0xeba   :  { %1758 = vadd.xlane.f32.xlu0 %v1757_v61  ;;  %v1804_v15 = vpack.c.bf16 %v1800_v14, %v1799_v2 }
 0xebb   :  { %v1760_v63 = vsel %vm234_vm3, %v1754_v62, 0.0 }
 0xebc   :  { %1761 = vadd.xlane.f32.xlu1 %v1760_v63  ;;  %4167 = vmatpush3.bf16.msra.mxu0 %v1804_v15 }
 0xebd   :  { %4168 = vmatprep.subr.bf16.mxu0 %v4612_v9 }
 0xec0   :  { %4169 = vmatpush3.bf16.msra.mxu0 %v1805_v18 }
 0xec1   :  { %4186 = vmatprep.subr.bf16.mxu0 %v4612_v9 }
 0xf47   :  { %v1759_v0 = vpop.xlane.xlu0 %1758 }
 0xf48   :  { %v1763_v3 = vmul.f32 0.03125, %v1759_v0 }
 0xf49   :  { %v1762_v4 = vpop.xlane.xlu1 %1761 }
 0xf4a   :  { %v1765_v5 = vsub.f32 %v1753_v60, %v1763_v3  ;;  %v1764_v7 = vmul.f32 0.03125, %v1762_v4 }
 0xf4c   :  { %v1766_v8 = vsub.f32 %v1754_v62, %v1764_v7  ;;  %v1767_v10 = vmul.f32 %v1765_v5, %v1765_v5 }
 0xf4e   :  { %v1769_v12 = vsel %vm234_vm3, %v1767_v10, 0.0  ;;  %v1768_v13 = vmul.f32 %v1766_v8, %v1766_v8 }
 0xf4f   :  { %1770 = vadd.xlane.f32.xlu0 %v1769_v12 }
 0xf50   :  { %v1772_v1 = vsel %vm234_vm3, %v1768_v13, 0.0  ;;  %v3876_v13 = vld [vmem:[%s5442_s15] ss:$0 sm:$0xff] }
 0xf53   :  { %1773 = vadd.xlane.f32.xlu0 %v1772_v1 }
 0xfdc   :  { %v1771_v20 = vpop.xlane.xlu0 %1770 }
 0xfdd   :  { %v1775_v22 = vmul.f32 0.03125, %v1771_v20 }
 0xfdf   :  { %v1777_v24 = vadd.f32 1e-12, %v1775_v22 }
 0xfe0   :  { %v1774_v25 = vpop.xlane.xlu0 %1773 }
 0xfe1   :  { %4431 = vrsqrt.f32 %v1777_v24  ;;  %v1776_v11 = vmul.f32 0.03125, %v1774_v25 }
 0xfe3   :  { %v1778_v6 = vadd.f32 1e-12, %v1776_v11 }
 0xfe5   :  { %4433 = vrsqrt.f32 %v1778_v6 }
 0xfeb   :  { %v4432_v26 = vpop.eup %4431 }
 0xfec   :  { %v1781_v19 = vmul.f32 %v4432_v26, %v1765_v5 }
 0xfee   :  { %v1789_v27 = vmul.f32 %v3872_v21, %v1781_v19 }
 0xfef   :  { %v4434_v23 = vpop.eup %4433 }
 0xff0   :  { %v1782_v28 = vmul.f32 %v4434_v23, %v1766_v8  ;;  %v1797_v31 = vadd.f32 %v3873_v29, %v1789_v27 }
 0xff2   :  { %v1790_v30 = vmul.f32 %v3872_v21, %v1782_v28 }
 0xff4   :  { %v5080_v32 = vadd.f32 %v3873_v29, %v1790_v30  ;;  %v3880_v30 = vld [vmem:[%s5433_s6 + $0x20] sm:$0xff] }
 0xff6   :  { %v1803_v33 = vpack.c.bf16 %v5080_v32, %v1797_v31 }
 0xff8   :  { %4171 = vmatmul.mubr.msk.bf16.vlgmr.msra.gmra.mrb[20].mxu0 %vm234_vm3, %v1803_v33  ;;  %v3882_v33 = vld [vmem:[%s5433_s6 + $0x30] sm:$0xff] }
 0xff9   :  { %4190 = vmatprep.mubr.msk.bf16.mxu0 %vm4613_vm4, %v4612_v9  ;;  %v1992_v35 = vpack.c.bf16 %v3883_v34, %v3882_v33 }
0x10cb   :  { %v1850_v49 = vpop.f32.mrb[20].mxu0 }
0x10cc   :  { %v1851_v50 = vadd.f32 %v3874_v48, %v1850_v49  ;;  %v4172_v51 = vpop.f32.mrb[21].mxu0 }
0x10cd   :  { %v1853_v52 = vpop.f32.mrb[22].mxu0 }
0x10ce   :  { %v1859_v53 = vmul.f32 0.044715, %v1851_v50  ;;  %v1854_v54 = vadd.f32 %v3874_v48, %v1853_v52  ;;  %v4173_v44 = vpop.f32.mrb[23].mxu0  ;;  %v1857_v4 = vmul.f32 0.5, %v1851_v50 }
0x10cf   :  { %v3885_v44 = vld [vmem:[%s5434_s7 + $0x1] ss:$0 sm:$0xff]  ;;  %s5465_s7 = smov 8  }
0x10d0   :  { %v1861_v46 = vmul.f32 %v1859_v53, %v1851_v50  ;;  %v1860_v55 = vmul.f32 0.044715, %v1854_v54  ;;  %v1858_v5 = vmul.f32 0.5, %v1854_v54 }
0x10d2   :  { %v1863_v56 = vmul.f32 %v1861_v46, %v1851_v50  ;;  %v1862_v57 = vmul.f32 %v1860_v55, %v1854_v54 }
0x10d4   :  { %v1865_v58 = vadd.f32 %v1863_v56, %v1851_v50  ;;  %v1864_v59 = vmul.f32 %v1862_v57, %v1854_v54  ;;  %v3879_v50 = vld [vmem:[#allocation7] ss:$0 sm:$0xff] }
0x10d6   :  { %v1867_v60 = vmul.f32 0.7978846, %v1865_v58  ;;  %v1866_v61 = vadd.f32 %v1864_v59, %v1854_v54 }
0x10d8   :  { %4435 = vtanh.f32 %v1867_v60  ;;  %v1868_v62 = vmul.f32 0.7978846, %v1866_v61 }
0x10da   :  { %4437 = vtanh.f32 %v1868_v62 }
0x10e2   :  { %v4436_v63 = vpop.eup %4435 }
0x10e3   :  { %v1871_v0 = vadd.f32 1.0, %v4436_v63 }
0x10e4   :  { %v4438_v3 = vpop.eup %4437 }
0x10e5   :  { %v1872_v7 = vadd.f32 1.0, %v4438_v3  ;;  %v1873_v8 = vmul.f32 %v1871_v0, %v1857_v4 }
0x10e7   :  { %v1874_v10 = vmul.f32 %v1872_v7, %v1858_v5 }
0x10e9   :  { %v1883_v12 = vpack.c.bf16 %v1874_v10, %v1873_v8 }
0x10eb   :  { %4183 = vmatmul.mubr.msk.bf16.vlgmr.msra.gmra.mrb[24].mxu1 %vm143_vm0, %v1883_v12 }
0x10ec   :  { %4206 = vmatprep.mubr.msk.f32.mxu1 %vm4613_vm4, %v4612_v9 }
0x11be   :  { %v1932_v1 = vpop.f32.mrb[24].mxu1 }
0x11bf   :  { %v1933_v2 = vadd.f32 %v3876_v13, %v1932_v1  ;;  %v4184_v14 = vpop.f32.mrb[25].mxu1 }
0x11c0   :  { %v1935_v15 = vpop.f32.mrb[26].mxu1 }
0x11c1   :  { %v1936_v16 = vadd.f32 %v3876_v13, %v1935_v15  ;;  %v4185_v17 = vpop.f32.mrb[27].mxu1  ;;  %v1939_v18 = vadd.f32 %v1933_v2, %v1797_v31  ;;  %v3881_v31 = vld [vmem:[%s5433_s6 + $0x28] sm:$0xff] }
0x11c3   :  { %v1943_v20 = vsel %vm234_vm3, %v1939_v18, 0.0  ;;  %v1940_v22 = vadd.f32 %v1936_v16, %v5080_v32  ;;  %v1991_v32 = vpack.c.bf16 %v3881_v31, %v3880_v30 }
0x11c4   :  { %1944 = vadd.xlane.f32.xlu1 %v1943_v20 }
0x11c5   :  { %v1946_v24 = vsel %vm234_vm3, %v1940_v22, 0.0  ;;  %4187 = vmatpush3.bf16.msra.mxu0 %v1991_v32 }
0x11c6   :  { %1947 = vadd.xlane.f32.xlu0 %v1946_v24  ;;  %4188 = vmatprep.subr.bf16.mxu0 %v4612_v9 }
0x11c9   :  { %4189 = vmatpush3.bf16.msra.mxu0 %v1992_v35 }
0x11ca   :  { %4194 = vmatprep.subr.mxu0 %v4612_v9 }
0x1251   :  { %v1945_v25 = vpop.xlane.xlu1 %1944 }
0x1252   :  { %v1949_v11 = vmul.f32 0.03125, %v1945_v25 }
0x1253   :  { %v1948_v6 = vpop.xlane.xlu0 %1947 }
0x1254   :  { %v1951_v26 = vsub.f32 %v1939_v18, %v1949_v11  ;;  %v1950_v19 = vmul.f32 0.03125, %v1948_v6 }
0x1256   :  { %v1952_v21 = vsub.f32 %v1940_v22, %v1950_v19  ;;  %v1953_v23 = vmul.f32 %v1951_v26, %v1951_v26 }
0x1258   :  { %v1955_v27 = vsel %vm234_vm3, %v1953_v23, 0.0  ;;  %v1954_v28 = vmul.f32 %v1952_v21, %v1952_v21 }
0x1259   :  { %1956 = vadd.xlane.f32.xlu1 %v1955_v27 }
0x125a   :  { %v1958_v29 = vsel %vm234_vm3, %v1954_v28, 0.0 }
0x125b   :  { %1959 = vadd.xlane.f32.xlu0 %v1958_v29 }
0x12e6   :  { %v1957_v36 = vpop.xlane.xlu1 %1956 }
0x12e7   :  { %v1961_v37 = vmul.f32 0.03125, %v1957_v36 }
0x12e8   :  { %v1960_v38 = vpop.xlane.xlu0 %1959 }
0x12e9   :  { %v1963_v39 = vadd.f32 1e-12, %v1961_v37  ;;  %v1962_v40 = vmul.f32 0.03125, %v1960_v38 }
0x12eb   :  { %4439 = vrsqrt.f32 %v1963_v39  ;;  %v1964_v41 = vadd.f32 1e-12, %v1962_v40 }
0x12ed   :  { %4441 = vrsqrt.f32 %v1964_v41 }
0x12f5   :  { %v4440_v42 = vpop.eup %4439 }
0x12f6   :  { %v1967_v45 = vmul.f32 %v4440_v42, %v1951_v26 }
0x12f7   :  { %v4442_v47 = vpop.eup %4441 }
0x12f8   :  { %v1975_v48 = vmul.f32 %v3878_v43, %v1967_v45  ;;  %v1968_v49 = vmul.f32 %v4442_v47, %v1952_v21 }
0x12fa   :  { %v1976_v51 = vmul.f32 %v3878_v43, %v1968_v49  ;;  %v5142_v52 = vadd.f32 %v3879_v50, %v1975_v48 }
0x12fc   :  { %v5144_v53 = vadd.f32 %v3879_v50, %v1976_v51 }
0x12fe   :  { %v1990_v54 = vpack.c.bf16 %v5144_v53, %v5142_v52 }
0x1300   :  { %4191 = vmatmul.mubr.msk.bf16.vlgmr.msra.gmra.mrb[24].mxu0 %vm234_vm3, %v1990_v54 }
0x1301   :  { %4196 = vmatprep.mubr.msk.f32.mxu0 %vm4613_vm4, %v4612_v9 }
0x13d3   :  { %v2038_v46 = vpop.f32.mrb[24].mxu0 }
0x13d4   :  { %v5154_v55 = vadd.f32 %v3885_v44, %v2038_v46  ;;  %v4192_v56 = vpop.f32.mrb[25].mxu0 }
0x13d5   :  { %v2041_v57 = vpop.f32.mrb[26].mxu0 }
0x13d6   :  { %v5156_v58 = vadd.f32 %v3885_v44, %v2041_v57  ;;  %2046 = vrot.lane.b32.xlu1 %v5154_v55, %s4614_s5  ;;  %v4193_v59 = vpop.f32.mrb[27].mxu0 }
0x13d8   :  { %2123 = vrot.lane.b32.xlu0 %v5156_v58, %s4614_s5  ;;  %s5466_s5 = smov 16  }
0x1448   :  { %v2047_v60 = vpop.permute.xlu1 %2046 }
0x1449   :  { %4195 = vmatpush3.xpose.msk.msra.mxu0 %vm339_vm5, %v2047_v60 }
0x144a   :  { %4199 = vmatprep.subr.mxu0 %v4612_v9  ;;  %v2124_v61 = vpop.permute.xlu0 %2123 }
0x144c   :  { %4197 = vmatmul.mubr.msk.f32.vlgmr.msra.gmra.mrb[28].mxu0 %vm339_vm5, %v5154_v55 }
0x144d   :  { %4200 = vmatpush3.xpose.msk.msra.mxu0 %vm339_vm5, %v2124_v61  ;;  %4201 = vmatprep.mubr.msk.f32.mxu0 %vm4613_vm4, %v4612_v9 }
0x144e   :  { %4209 = vmatprep.subr.mxu0 %v4612_v9 }
0x1450   :  { %4202 = vmatmul.mubr.msk.f32.vlgmr.msra.gmra.mrb[30].mxu0 %vm339_vm5, %v5156_v58 }
0x1451   :  { %4211 = vmatprep.mubr.msk.f32.mxu0 %vm4613_vm4, %v4612_v9 }
0x151f   :  { %v2118_v62 = vpop.f32.mrb[28].mxu0 }
0x1520   :  { %v2199_v63 = vmul.f32 0.35355338, %v2118_v62  ;;  %v4198_v0 = vpop.f32.mrb[29].mxu0 }
0x1522   :  { %v2201_v3 = vsel %vm339_vm5, %v2199_v63, -inf }
0x1523   :  { %2202 = vmax.xlane.f32.xlu1 %v2201_v3  ;;  %v2195_v4 = vpop.f32.mrb[30].mxu0 }
0x1524   :  { %v2200_v5 = vmul.f32 0.35355338, %v2195_v4  ;;  %v4203_v7 = vpop.f32.mrb[31].mxu0 }
0x1526   :  { %v2204_v8 = vsel %vm339_vm5, %v2200_v5, -inf }
0x1527   :  { %2205 = vmax.xlane.f32.xlu0 %v2204_v8 }
0x1534   :  { %2223 = vrot.lane.b32.xlu1 %v5154_v55, %s4615_s1 }
0x1538   :  { %2377 = vrot.lane.b32.xlu1 %v5154_v55, %s4616_s28 }
0x153c   :  { %2455 = vrot.lane.b32.xlu1 %v5156_v58, %s4616_s28 }
0x153d   :  { %2299 = vrot.lane.b32.xlu0 %v5156_v58, %s4615_s1 }
0x15b0   :  { %v2203_v10 = vpop.xlane.xlu1 %2202 }
0x15b1   :  { %v2207_v12 = vsub.f32 %v2199_v63, %v2203_v10 }
0x15b3   :  { %v2209_v13 = vmul.f32 1.442695, %v2207_v12 }
0x15b4   :  { %v2224_v1 = vpop.permute.xlu1 %2223  ;;  %v2206_v2 = vpop.xlane.xlu0 %2205 }
0x15b5   :  { %4443 = vpow2.f32 %v2209_v13  ;;  %v2208_v14 = vsub.f32 %v2200_v5, %v2206_v2  ;;  %4205 = vmatpush3.msra.mxu1 %v2224_v1 }
0x15b6   :  { %4214 = vmatprep.subr.mxu1 %v4612_v9 }
0x15b7   :  { %v2211_v15 = vmul.f32 1.442695, %v2208_v14 }
0x15b8   :  { %v2300_v16 = vpop.permute.xlu0 %2299  ;;  %v2378_v24 = vpop.permute.xlu1 %2377 }
0x15b9   :  { %4445 = vpow2.f32 %v2211_v15  ;;  %4210 = vmatpush3.msra.mxu0 %v2300_v16 }
0x15ba   :  { %4219 = vmatprep.subr.mxu0 %v4612_v9 }
0x15bc   :  { %v2456_v25 = vpop.permute.xlu1 %2455 }
0x15bf   :  { %v4444_v17 = vpop.eup %4443 }
0x15c0   :  { %v2213_v18 = vsel %vm339_vm5, %v4444_v17, 0.0 }
0x15c1   :  { %2214 = vadd.xlane.f32.xlu1 %v2213_v18 }
0x15c3   :  { %v4446_v20 = vpop.eup %4445 }
0x15c4   :  { %v2216_v22 = vsel %vm339_vm5, %v4446_v20, 0.0 }
0x15c5   :  { %2217 = vadd.xlane.f32.xlu0 %v2216_v22 }
0x15d2   :  { %2453 = vrot.lane.b32.xlu1 %v5156_v58, %s4617_s22 }
0x15db   :  { %2375 = vrot.lane.b32.xlu0 %v5154_v55, %s4617_s22 }
0x164e   :  { %v2215_v11 = vpop.xlane.xlu1 %2214 }
0x164f   :  { %4447 = vrcp.f32 %v2215_v11 }
0x1652   :  { %v2218_v6 = vpop.xlane.xlu0 %2217  ;;  %v2454_v28 = vpop.permute.xlu1 %2453 }
0x1653   :  { %4449 = vrcp.f32 %v2218_v6 }
0x1656   :  { %v2376_v27 = vpop.permute.xlu0 %2375 }
0x1659   :  { %v4448_v26 = vpop.eup %4447 }
0x165a   :  { %v2221_v19 = vmul.f32 %v4448_v26, %v4444_v17 }
0x165c   :  { %4207 = vmatmul.mubr.msk.f32.vlgmr.msra.gmra.mrb[18].mxu1 %vm339_vm5, %v2221_v19 }
0x165d   :  { %v4450_v21 = vpop.eup %4449  ;;  %4215 = vmatpush3.xpose.msk.msra.mxu1 %vm339_vm5, %v2378_v24  ;;  %4216 = vmatprep.mubr.msk.f32.mxu1 %vm4613_vm4, %v4612_v9 }
0x165e   :  { %v2222_v23 = vmul.f32 %v4450_v21, %v4446_v20  ;;  %4224 = vmatprep.subr.mxu1 %v4612_v9 }
0x1660   :  { %4212 = vmatmul.mubr.msk.f32.vlgmr.msra.gmra.mrb[32].mxu0 %vm339_vm5, %v2222_v23  ;;  %4217 = vmatmul.mubr.msk.f32.vlgmr.msra.gmra.mrb[28].mxu1 %vm339_vm5, %v2376_v27 }
0x1661   :  { %4220 = vmatpush3.xpose.msk.msra.mxu0 %vm339_vm5, %v2456_v25  ;;  %4221 = vmatprep.mubr.msk.f32.mxu0 %vm4613_vm4, %v4612_v9 }
0x1662   :  { %4229 = vmatprep.subr.mxu0 %v4612_v9  ;;  %4226 = vmatprep.mubr.msk.f32.mxu1 %vm4613_vm4, %v4612_v9 }
0x1664   :  { %4222 = vmatmul.mubr.msk.f32.vlgmr.msra.gmra.mrb[34].mxu0 %vm339_vm5, %v2454_v28 }
0x1665   :  { %4231 = vmatprep.mubr.msk.f32.mxu0 %vm4613_vm4, %v4612_v9 }
0x172f   :  { %v5208_v29 = vpop.f32.mrb[18].mxu1 }
0x1730   :  { %v4208_v30 = vpop.f32.mrb[19].mxu1 }
0x1733   :  { %v5210_v31 = vpop.f32.mrb[32].mxu0  ;;  %v2449_v32 = vpop.f32.mrb[28].mxu1 }
0x1734   :  { %v2531_v33 = vmul.f32 0.35355338, %v2449_v32  ;;  %v4213_v34 = vpop.f32.mrb[33].mxu0  ;;  %v4218_v35 = vpop.f32.mrb[29].mxu1 }
0x1736   :  { %v2533_v36 = vsel %vm339_vm5, %v2531_v33, -inf }
0x1737   :  { %v2527_v37 = vpop.f32.mrb[34].mxu0  ;;  %2534 = vmax.xlane.f32.xlu0 %v2533_v36 }
0x1738   :  { %v2532_v38 = vmul.f32 0.35355338, %v2527_v37  ;;  %v4223_v39 = vpop.f32.mrb[35].mxu0 }
0x173a   :  { %v2536_v40 = vsel %vm339_vm5, %v2532_v38, -inf }
0x173b   :  { %2537 = vmax.xlane.f32.xlu1 %v2536_v40 }
0x174c   :  { %2555 = vrot.lane.b32.xlu1 %v5154_v55, %s4618_s30 }
0x174d   :  { %2631 = vrot.lane.b32.xlu0 %v5156_v58, %s4618_s30 }
0x1750   :  { %2709 = vrot.lane.b32.xlu1 %v5154_v55, %s4619_s19 }
0x1754   :  { %2787 = vrot.lane.b32.xlu1 %v5156_v58, %s4619_s19 }
0x1758   :  { %2785 = vrot.lane.b32.xlu1 %v5156_v58, %s4620_s16 }
0x17c4   :  { %v2535_v41 = vpop.xlane.xlu0 %2534 }
0x17c5   :  { %v2539_v42 = vsub.f32 %v2531_v33, %v2535_v41 }
0x17c7   :  { %v2541_v43 = vmul.f32 1.442695, %v2539_v42 }
0x17c8   :  { %v2538_v45 = vpop.xlane.xlu1 %2537  ;;  %v2632_v47 = vpop.permute.xlu0 %2631 }
0x17c9   :  { %4451 = vpow2.f32 %v2541_v43  ;;  %v2540_v48 = vsub.f32 %v2532_v38, %v2538_v45  ;;  %4230 = vmatpush3.msra.mxu0 %v2632_v47 }
0x17ca   :  { %4239 = vmatprep.subr.mxu0 %v4612_v9 }
0x17cb   :  { %v2543_v49 = vmul.f32 1.442695, %v2540_v48 }
0x17cc   :  { %v2556_v50 = vpop.permute.xlu1 %2555 }
0x17cd   :  { %4453 = vpow2.f32 %v2543_v49  ;;  %4225 = vmatpush3.msra.mxu1 %v2556_v50 }
0x17ce   :  { %4234 = vmatprep.subr.mxu1 %v4612_v9 }
0x17d0   :  { %v2710_v59 = vpop.permute.xlu1 %2709 }
0x17d3   :  { %v4452_v51 = vpop.eup %4451 }
0x17d4   :  { %v2545_v54 = vsel %vm339_vm5, %v4452_v51, 0.0  ;;  %v2788_v63 = vpop.permute.xlu1 %2787 }
0x17d5   :  { %2546 = vadd.xlane.f32.xlu0 %v2545_v54 }
0x17d7   :  { %v4454_v44 = vpop.eup %4453 }
0x17d8   :  { %v2548_v46 = vsel %vm339_vm5, %v4454_v44, 0.0  ;;  %v2786_v4 = vpop.permute.xlu1 %2785 }
0x17d9   :  { %2549 = vadd.xlane.f32.xlu0 %v2548_v46 }
0x17ef   :  { %2707 = vrot.lane.b32.xlu0 %v5154_v55, %s4620_s16 }
0x1862   :  { %v2547_v56 = vpop.xlane.xlu0 %2546 }
0x1863   :  { %4455 = vrcp.f32 %v2547_v56 }
0x1866   :  { %v2550_v57 = vpop.xlane.xlu0 %2549 }
0x1867   :  { %4457 = vrcp.f32 %v2550_v57 }
0x186a   :  { %v2708_v3 = vpop.permute.xlu0 %2707 }
0x186d   :  { %v4456_v60 = vpop.eup %4455 }
0x186e   :  { %v2553_v61 = vmul.f32 %v4456_v60, %v4452_v51 }
0x1870   :  { %4227 = vmatmul.mubr.msk.f32.vlgmr.msra.gmra.mrb[30].mxu1 %vm339_vm5, %v2553_v61 }
0x1871   :  { %v4458_v62 = vpop.eup %4457  ;;  %4235 = vmatpush3.xpose.msk.msra.mxu1 %vm339_vm5, %v2710_v59  ;;  %4236 = vmatprep.mubr.msk.f32.mxu1 %vm4613_vm4, %v4612_v9 }
0x1872   :  { %v2554_v0 = vmul.f32 %v4458_v62, %v4454_v44  ;;  %4244 = vmatprep.subr.mxu1 %v4612_v9 }
0x1874   :  { %4232 = vmatmul.mubr.msk.f32.vlgmr.msra.gmra.mrb[36].mxu0 %vm339_vm5, %v2554_v0  ;;  %4237 = vmatmul.mubr.msk.f32.vlgmr.msra.gmra.mrb[32].mxu1 %vm339_vm5, %v2708_v3 }
0x1875   :  { %4240 = vmatpush3.xpose.msk.msra.mxu0 %vm339_vm5, %v2788_v63  ;;  %4241 = vmatprep.mubr.msk.f32.mxu0 %vm4613_vm4, %v4612_v9 }
0x1876   :  { %4249 = vmatprep.subr.mxu0 %v4612_v9  ;;  %4246 = vmatprep.mubr.msk.f32.mxu1 %vm4613_vm4, %v4612_v9 }
0x1878   :  { %4242 = vmatmul.mubr.msk.f32.vlgmr.msra.gmra.mrb[38].mxu0 %vm339_vm5, %v2786_v4 }
0x1879   :  { %4251 = vmatprep.mubr.msk.f32.mxu0 %vm4613_vm4, %v4612_v9 }
0x1943   :  { %v5246_v5 = vpop.f32.mrb[30].mxu1 }
0x1944   :  { %v4228_v7 = vpop.f32.mrb[31].mxu1 }
0x1947   :  { %v5248_v8 = vpop.f32.mrb[36].mxu0  ;;  %v2781_v10 = vpop.f32.mrb[32].mxu1 }
0x1948   :  { %v4380_v12 = vpack.i.bf16 %v5248_v8, %v5246_v5  ;;  %v2863_v13 = vmul.f32 0.35355338, %v2781_v10  ;;  %v4233_v1 = vpop.f32.mrb[37].mxu0  ;;  %v4238_v2 = vpop.f32.mrb[33].mxu1 }
0x194a   :  { %v2865_v14 = vsel %vm339_vm5, %v2863_v13, -inf }
0x194b   :  { %v2859_v15 = vpop.f32.mrb[38].mxu0  ;;  %2866 = vmax.xlane.f32.xlu0 %v2865_v14  ;;  %v3912_v14 = vld [vmem:[%s5435_s8 + $0x28] sm:$0xff] }
0x194c   :  { %v2864_v16 = vmul.f32 0.35355338, %v2859_v15  ;;  %v4243_v17 = vpop.f32.mrb[39].mxu0 }
0x194d   :  { %v3914_v17 = vld [vmem:[%s5435_s8 + $0x38] sm:$0xff] }
0x194e   :  { %v2868_v18 = vsel %vm339_vm5, %v2864_v16, -inf }
0x194f   :  { %2869 = vmax.xlane.f32.xlu1 %v2868_v18 }
0x1960   :  { %2887 = vrot.lane.b32.xlu1 %v5154_v55, %s4621_s0 }
0x1961   :  { %2963 = vrot.lane.b32.xlu0 %v5156_v58, %s4621_s0 }
0x1964   :  { %3041 = vrot.lane.b32.xlu1 %v5154_v55, %s4622_s21 }
0x1968   :  { %3119 = vrot.lane.b32.xlu1 %v5156_v58, %s4622_s21 }
0x196c   :  { %3117 = vrot.lane.b32.xlu1 %v5156_v58, %s4623_s23 }
0x19d8   :  { %v2867_v20 = vpop.xlane.xlu0 %2866 }
0x19d9   :  { %v2871_v22 = vsub.f32 %v2863_v13, %v2867_v20 }
0x19db   :  { %v2873_v24 = vmul.f32 1.442695, %v2871_v22 }
0x19dc   :  { %v2870_v25 = vpop.xlane.xlu1 %2869  ;;  %v2964_v11 = vpop.permute.xlu0 %2963 }
0x19dd   :  { %4459 = vpow2.f32 %v2873_v24  ;;  %v2872_v6 = vsub.f32 %v2864_v16, %v2870_v25  ;;  %4250 = vmatpush3.msra.mxu0 %v2964_v11  ;;  %v3913_v16 = vld [vmem:[%s5435_s8 + $0x30] sm:$0xff] }
0x19de   :  { %4259 = vmatprep.subr.mxu0 %v4612_v9  ;;  %v3408_v18 = vpack.c.bf16 %v3914_v17, %v3913_v16  ;;  %v3921_v16 = vld [vmem:[%s5438_s11 + $0x1] ss:$0 sm:$0xff] }
0x19df   :  { %v2875_v26 = vmul.f32 1.442695, %v2872_v6 }
0x19e0   :  { %v2888_v19 = vpop.permute.xlu1 %2887 }
0x19e1   :  { %4461 = vpow2.f32 %v2875_v26  ;;  %4245 = vmatpush3.msra.mxu1 %v2888_v19 }
0x19e2   :  { %4254 = vmatprep.subr.mxu1 %v4612_v9 }
0x19e4   :  { %v3042_v33 = vpop.permute.xlu1 %3041 }
0x19e7   :  { %v4460_v21 = vpop.eup %4459 }
0x19e8   :  { %v2877_v23 = vsel %vm339_vm5, %v4460_v21, 0.0  ;;  %v3120_v37 = vpop.permute.xlu1 %3119 }
0x19e9   :  { %2878 = vadd.xlane.f32.xlu0 %v2877_v23 }
0x19eb   :  { %v4462_v27 = vpop.eup %4461 }
0x19ec   :  { %v2880_v28 = vsel %vm339_vm5, %v4462_v27, 0.0  ;;  %v3118_v40 = vpop.permute.xlu1 %3117 }
0x19ed   :  { %2881 = vadd.xlane.f32.xlu0 %v2880_v28 }
0x1a03   :  { %3039 = vrot.lane.b32.xlu0 %v5154_v55, %s4623_s23  ;;  %s5467_s23 = smov 24  }
0x1a76   :  { %v2879_v30 = vpop.xlane.xlu0 %2878 }
0x1a77   :  { %4463 = vrcp.f32 %v2879_v30 }
0x1a7a   :  { %v2882_v32 = vpop.xlane.xlu0 %2881 }
0x1a7b   :  { %4465 = vrcp.f32 %v2882_v32 }
0x1a7e   :  { %v3040_v39 = vpop.permute.xlu0 %3039 }
0x1a81   :  { %v4464_v34 = vpop.eup %4463 }
0x1a82   :  { %v2885_v35 = vmul.f32 %v4464_v34, %v4460_v21 }
0x1a84   :  { %4247 = vmatmul.mubr.msk.f32.vlgmr.msra.gmra.mrb[34].mxu1 %vm339_vm5, %v2885_v35 }
0x1a85   :  { %v4466_v36 = vpop.eup %4465  ;;  %4255 = vmatpush3.xpose.msk.msra.mxu1 %vm339_vm5, %v3042_v33  ;;  %4256 = vmatprep.mubr.msk.f32.mxu1 %vm4613_vm4, %v4612_v9 }
0x1a86   :  { %v2886_v38 = vmul.f32 %v4466_v36, %v4462_v27  ;;  %4264 = vmatprep.subr.mxu1 %v4612_v9 }
0x1a88   :  { %4252 = vmatmul.mubr.msk.f32.vlgmr.msra.gmra.mrb[40].mxu0 %vm339_vm5, %v2886_v38  ;;  %4257 = vmatmul.mubr.msk.f32.vlgmr.msra.gmra.mrb[36].mxu1 %vm339_vm5, %v3040_v39 }
0x1a89   :  { %4260 = vmatpush3.xpose.msk.msra.mxu0 %vm339_vm5, %v3120_v37  ;;  %4261 = vmatprep.mubr.msk.f32.mxu0 %vm4613_vm4, %v4612_v9 }
0x1a8a   :  { %4269 = vmatprep.subr.mxu0 %v4612_v9  ;;  %4266 = vmatprep.mubr.msk.f32.mxu1 %vm4613_vm4, %v4612_v9 }
0x1a8c   :  { %4262 = vmatmul.mubr.msk.f32.vlgmr.msra.gmra.mrb[42].mxu0 %vm339_vm5, %v3118_v40 }
0x1a8d   :  { %4271 = vmatprep.mubr.msk.f32.mxu0 %vm4613_vm4, %v4612_v9 }
0x1b57   :  { %v2959_v41 = vpop.f32.mrb[34].mxu1 }
0x1b58   :  { %v4248_v42 = vpop.f32.mrb[35].mxu1 }
0x1b5b   :  { %v3035_v43 = vpop.f32.mrb[40].mxu0  ;;  %v3113_v45 = vpop.f32.mrb[36].mxu1 }
0x1b5c   :  { %v4385_v47 = vpack.i.bf16 %v3035_v43, %v2959_v41  ;;  %v3195_v48 = vmul.f32 0.35355338, %v3113_v45  ;;  %v4253_v49 = vpop.f32.mrb[41].mxu0  ;;  %v4258_v50 = vpop.f32.mrb[37].mxu1 }
0x1b5e   :  { %v3197_v51 = vsel %vm339_vm5, %v3195_v48, -inf }
0x1b5f   :  { %v3191_v54 = vpop.f32.mrb[42].mxu0  ;;  %3198 = vmax.xlane.f32.xlu0 %v3197_v51 }
0x1b60   :  { %v3196_v44 = vmul.f32 0.35355338, %v3191_v54  ;;  %v4263_v46 = vpop.f32.mrb[43].mxu0 }
0x1b62   :  { %v3200_v56 = vsel %vm339_vm5, %v3196_v44, -inf }
0x1b63   :  { %3201 = vmax.xlane.f32.xlu1 %v3200_v56 }
0x1b74   :  { %3219 = vrot.lane.b32.xlu1 %v5154_v55, %s4624_s20 }
0x1b78   :  { %4381 = vrot.lane.b32.xlu1 %v4380_v12, %s5465_s7  ;;  %s4631_s7 = smov 28  }
0x1b7c   :  { %4386 = vrot.lane.b32.xlu1 %v4385_v47, %s5466_s5  ;;  %s4633_s5 = smov [#allocation10]  }
0x1bec   :  { %v3199_v57 = vpop.xlane.xlu0 %3198 }
0x1bed   :  { %v3203_v59 = vsub.f32 %v3195_v48, %v3199_v57 }
0x1bef   :  { %v3205_v60 = vmul.f32 1.442695, %v3203_v59 }
0x1bf0   :  { %v3202_v61 = vpop.xlane.xlu1 %3201 }
0x1bf1   :  { %4467 = vpow2.f32 %v3205_v60  ;;  %v3204_v62 = vsub.f32 %v3196_v44, %v3202_v61 }
0x1bf3   :  { %v3207_v63 = vmul.f32 1.442695, %v3204_v62  ;;  %v3923_v62 = vld [vmem:[%s5439_s12 + $0x28] sm:$0xff] }
0x1bf4   :  { %v3220_v0 = vpop.permute.xlu1 %3219 }
0x1bf5   :  { %4469 = vpow2.f32 %v3207_v63  ;;  %4265 = vmatpush3.msra.mxu1 %v3220_v0  ;;  %v3924_v0 = vld [vmem:[%s5439_s12 + $0x30] sm:$0xff] }
0x1bf6   :  { %4274 = vmatprep.subr.bf16.mxu1 %v4612_v9 }
0x1bf8   :  { %v4382_v6 = vpop.permute.xlu1 %4381 }
0x1bf9   :  { %v4384_v19 = vunpack.i.h.bf16 %v4382_v6  ;;  %v4383_v21 = vunpack.i.l.bf16 %v4382_v6 }
0x1bfb   :  { %v4468_v55 = vpop.eup %4467  ;;  %v3396_v30 = vsel %vm339_vm5, %v5210_v31, %v4384_v19  ;;  %v3395_v32 = vsel %vm339_vm5, %v5208_v29, %v4383_v21  ;;  %v3916_v29 = vld [vmem:[%s5436_s9 + $0x1] ss:$0 sm:$0xff] }
0x1bfc   :  { %v3209_v3 = vsel %vm339_vm5, %v4468_v55, 0.0  ;;  %v4387_v26 = vpop.permute.xlu1 %4386  ;;  %v3933_v21 = vld [vmem:[%s5441_s14 + $0x60] sm:$0xff] }
0x1bfd   :  { %3210 = vadd.xlane.f32.xlu0 %v3209_v3  ;;  %v4389_v23 = vunpack.i.h.bf16 %v4387_v26  ;;  %v4388_v27 = vunpack.i.l.bf16 %v4387_v26  ;;  %v3932_v26 = vld [vmem:[%s5441_s14 + $0x58] sm:$0xff] }
0x1bff   :  { %v4470_v4 = vpop.eup %4469  ;;  %v3398_v35 = vsel %vm1689_vm6, %v3396_v30, %v4389_v23  ;;  %v3397_v36 = vsel %vm1689_vm6, %v3395_v32, %v4388_v27  ;;  %v3934_v23 = vld [vmem:[%s5441_s14 + $0x68] sm:$0xff]  ;;  %v3936_v30 = vld [vmem:[%s5441_s14 + $0x78] sm:$0xff] }
0x1c00   :  { %v3212_v5 = vsel %vm339_vm5, %v4470_v4, 0.0  ;;  %v3599_v27 = vpack.c.bf16 %v3934_v23, %v3933_v21 }
0x1c01   :  { %3213 = vadd.xlane.f32.xlu0 %v3212_v5 }
0x1c17   :  { %3295 = vrot.lane.b32.xlu0 %v5156_v58, %s4624_s20  ;;  %v3911_v58 = vld [vmem:[%s5435_s8 + $0x20] sm:$0xff] }
0x1c18   :  { %v3407_v15 = vpack.c.bf16 %v3912_v14, %v3911_v58 }
0x1c8a   :  { %v3211_v7 = vpop.xlane.xlu0 %3210 }
0x1c8b   :  { %4471 = vrcp.f32 %v3211_v7 }
0x1c8e   :  { %v3214_v8 = vpop.xlane.xlu0 %3213 }
0x1c8f   :  { %4473 = vrcp.f32 %v3214_v8 }
0x1c92   :  { %v3296_v10 = vpop.permute.xlu0 %3295 }
0x1c93   :  { %4270 = vmatpush3.msra.mxu0 %v3296_v10 }
0x1c94   :  { %4282 = vmatprep.subr.bf16.mxu0 %v4612_v9 }
0x1c95   :  { %v4472_v12 = vpop.eup %4471 }
0x1c96   :  { %v3217_v13 = vmul.f32 %v4472_v12, %v4468_v55  ;;  %v3925_v55 = vld [vmem:[%s5439_s12 + $0x38] sm:$0xff] }
0x1c97   :  { %v3516_v3 = vpack.c.bf16 %v3925_v55, %v3924_v0 }
0x1c98   :  { %4267 = vmatmul.mubr.msk.f32.vlgmr.msra.gmra.mrb[38].mxu1 %vm339_vm5, %v3217_v13 }
0x1c99   :  { %v4474_v1 = vpop.eup %4473  ;;  %4278 = vmatprep.mubr.msk.bf16.mxu1 %vm4613_vm4, %v4612_v9  ;;  %4275 = vmatpush3.bf16.msra.mxu1 %v3407_v15 }
0x1c9a   :  { %v3218_v2 = vmul.f32 %v4474_v1, %v4470_v4  ;;  %4276 = vmatprep.subr.bf16.mxu1 %v4612_v9  ;;  %v3920_v1 = vld [vmem:[%s5437_s10 + $0x1] ss:$0 sm:$0xff]  ;;  %s3827_s10 = sshll.u32 %s4633_s5, 4  ;;  %s3828_s10 = int_to_ptr.vmem [resolvable:$true] %s3827_s10 }
0x1c9b   :  { %s4575_s1 = scalar_lea.vmem %s3828_s10, 32  ;;  %p4580_p5 = scmp.lt.s32.totalorder %s3828_s10, %s3828_s10 }
0x1c9c   :  { %4272 = vmatmul.mubr.msk.f32.vlgmr.msra.gmra.mrb[44].mxu0 %vm339_vm5, %v3218_v2  ;;  %p4576_p4 = scmp.ne.s32.totalorder %s3828_s10, %s4575_s1  ;;  %p4581_p6 = scmp.lt.s32.totalorder %s4575_s1, %s4575_s1 }
0x1c9d   :  { %4286 = vmatprep.mubr.msk.bf16.mxu0 %vm4613_vm4, %v4612_v9  ;;  %4277 = vmatpush3.bf16.msra.mxu1 %v3408_v18 }
0x1c9e   :  { %4290 = vmatprep.subr.bf16.mxu1 %v4612_v9  ;;  %p4582_p7 = por %p4581_p6, %p4580_p5 }
0x1ca0   :  { %p4583_p8 = pnand %p4582_p7, %p4576_p4 }
0x1d6b   :  { %v3291_v20 = vpop.f32.mrb[38].mxu1 }
0x1d6c   :  { %v4268_v22 = vpop.f32.mrb[39].mxu1 }
0x1d6f   :  { %v3367_v24 = vpop.f32.mrb[44].mxu0 }
0x1d70   :  { %v4390_v25 = vpack.i.bf16 %v3367_v24, %v3291_v20  ;;  %v4273_v11 = vpop.f32.mrb[45].mxu0  ;;  %v3929_v24 = vld [vmem:[%s5441_s14 + $0x40] sm:$0xff] }
0x1d71   :  { %v3931_v11 = vld [vmem:[%s5441_s14 + $0x50] sm:$0xff] }
0x1d72   :  { %4391 = vrot.lane.b32.xlu0 %v4390_v25, %s5467_s23  ;;  %v3930_v25 = vld [vmem:[%s5441_s14 + $0x48] sm:$0xff]  ;;  %v3598_v19 = vpack.c.bf16 %v3932_v26, %v3931_v11 }
0x1d73   :  { %v3597_v6 = vpack.c.bf16 %v3930_v25, %v3929_v24  ;;  %v3709_v24 = vld [vmem:[%s5445_s18 + $0x18] sm:$0xff] }
0x1de4   :  { %v4392_v28 = vpop.permute.xlu0 %4391 }
0x1de5   :  { %v4394_v33 = vunpack.i.h.bf16 %v4392_v28  ;;  %v4393_v34 = vunpack.i.l.bf16 %v4392_v28  ;;  %v3935_v28 = vld [vmem:[%s5441_s14 + $0x70] sm:$0xff] }
0x1de6   :  { %v3600_v32 = vpack.c.bf16 %v3936_v30, %v3935_v28 }
0x1de7   :  { %v3400_v37 = vsel %vm1692_vm7, %v3398_v35, %v4394_v33  ;;  %v3399_v38 = vsel %vm1692_vm7, %v3397_v36, %v4393_v34  ;;  %v3927_v33 = vld [vmem:[%s5440_s13 + $0x1] ss:$0 sm:$0xff] }
0x1de8   :  { %v3406_v39 = vpack.c.bf16 %v3400_v37, %v3399_v38 }
0x1dea   :  { %4279 = vmatmul.mubr.msk.bf16.vlgmr.msra.gmra.mrb[40].mxu1 %vm234_vm3, %v3406_v39 }
0x1deb   :  { %4298 = vmatprep.mubr.msk.bf16.mxu1 %vm4613_vm4, %v4612_v9  ;;  %4291 = vmatpush3.bf16.msra.mxu1 %v3597_v6 }
0x1dec   :  { %4292 = vmatprep.subr.bf16.mxu1 %v4612_v9 }
0x1def   :  { %4293 = vmatpush3.bf16.msra.mxu1 %v3598_v19 }
0x1df0   :  { %4294 = vmatprep.subr.bf16.mxu1 %v4612_v9 }
0x1df3   :  { %4295 = vmatpush3.bf16.msra.mxu1 %v3599_v27 }
0x1df4   :  { %4296 = vmatprep.subr.bf16.mxu1 %v4612_v9 }
0x1df7   :  { %4297 = vmatpush3.bf16.msra.mxu1 %v3600_v32  ;;  %v3940_v32 = vld [vmem:[#allocation5 + $0x1] ss:$0 sm:$0xff] }
0x1ebd   :  { %v3454_v31 = vpop.f32.mrb[40].mxu1 }
0x1ebe   :  { %v3455_v40 = vadd.f32 %v3916_v29, %v3454_v31  ;;  %v4280_v41 = vpop.f32.mrb[41].mxu1 }
0x1ebf   :  { %v3457_v42 = vpop.f32.mrb[42].mxu1 }
0x1ec0   :  { %v3458_v43 = vadd.f32 %v3916_v29, %v3457_v42  ;;  %v4281_v45 = vpop.f32.mrb[43].mxu1  ;;  %v3461_v47 = vadd.f32 %v3455_v40, %v5142_v52 }
0x1ec2   :  { %v3462_v48 = vadd.f32 %v3458_v43, %v5144_v53  ;;  %v3467_v49 = vsel %vm234_vm3, %v3461_v47, 0.0  ;;  %v3922_v53 = vld [vmem:[%s5439_s12 + $0x20] sm:$0xff]  ;;  %s4629_s12 = smov 100  }
0x1ec3   :  { %3468 = vadd.xlane.f32.xlu1 %v3467_v49  ;;  %v3515_v63 = vpack.c.bf16 %v3923_v62, %v3922_v53 }
0x1ec4   :  { %v3470_v50 = vsel %vm234_vm3, %v3462_v48, 0.0 }
0x1ec5   :  { %3471 = vadd.xlane.f32.xlu0 %v3470_v50  ;;  %4283 = vmatpush3.bf16.msra.mxu0 %v3515_v63 }
0x1ec6   :  { %4284 = vmatprep.subr.bf16.mxu0 %v4612_v9 }
0x1ec9   :  { %4285 = vmatpush3.bf16.msra.mxu0 %v3516_v3 }
0x1f50   :  { %v3469_v51 = vpop.xlane.xlu1 %3468 }
0x1f51   :  { %v3473_v54 = vmul.f32 0.03125, %v3469_v51 }
0x1f52   :  { %v3472_v44 = vpop.xlane.xlu0 %3471 }
0x1f53   :  { %v3475_v46 = vsub.f32 %v3461_v47, %v3473_v54  ;;  %v3474_v56 = vmul.f32 0.03125, %v3472_v44 }
0x1f55   :  { %v3476_v57 = vsub.f32 %v3462_v48, %v3474_v56  ;;  %v3477_v59 = vmul.f32 %v3475_v46, %v3475_v46 }
0x1f57   :  { %v3479_v60 = vsel %vm234_vm3, %v3477_v59, 0.0  ;;  %v3478_v61 = vmul.f32 %v3476_v57, %v3476_v57 }
0x1f58   :  { %3480 = vadd.xlane.f32.xlu0 %v3479_v60  ;;  %v3938_v60 = vld [vmem:[%s5442_s15 + $0x1] ss:$0 sm:$0xff] }
0x1f59   :  { %v3482_v52 = vsel %vm234_vm3, %v3478_v61, 0.0 }
0x1f5a   :  { %3483 = vadd.xlane.f32.xlu1 %v3482_v52 }
0x1fe5   :  { %v3481_v4 = vpop.xlane.xlu0 %3480 }
0x1fe6   :  { %v3485_v5 = vmul.f32 0.03125, %v3481_v4 }
0x1fe7   :  { %v3484_v7 = vpop.xlane.xlu1 %3483 }
0x1fe8   :  { %v3487_v8 = vadd.f32 1e-12, %v3485_v5  ;;  %v3486_v10 = vmul.f32 0.03125, %v3484_v7 }
0x1fea   :  { %4475 = vrsqrt.f32 %v3487_v8  ;;  %v3488_v12 = vadd.f32 1e-12, %v3486_v10 }
0x1fec   :  { %4477 = vrsqrt.f32 %v3488_v12 }
0x1ff4   :  { %v4476_v13 = vpop.eup %4475 }
0x1ff5   :  { %v3491_v2 = vmul.f32 %v4476_v13, %v3475_v46 }
0x1ff6   :  { %v4478_v58 = vpop.eup %4477 }
0x1ff7   :  { %v3499_v14 = vmul.f32 %v3920_v1, %v3491_v2  ;;  %v3492_v15 = vmul.f32 %v4478_v58, %v3476_v57 }
0x1ff9   :  { %v3500_v17 = vmul.f32 %v3920_v1, %v3492_v15  ;;  %v3507_v18 = vadd.f32 %v3921_v16, %v3499_v14 }
0x1ffb   :  { %v3508_v20 = vadd.f32 %v3921_v16, %v3500_v17  ;;  %v3706_v16 = vld [vmem:[%s5445_s18] sm:$0xff]  ;;  %v3707_v17 = vld [vmem:[%s5445_s18 + $0x8] sm:$0xff] }
0x1ffd   :  { %v3514_v22 = vpack.c.bf16 %v3508_v20, %v3507_v18 }
0x1fff   :  { %4287 = vmatmul.mubr.msk.bf16.vlgmr.msra.gmra.mrb[48].mxu0 %vm234_vm3, %v3514_v22  ;;  %v4330_v22 = vpack.c.bf16 %v3707_v17, %v3706_v16 }
0x2000   :  { %4310 = vmatprep.mubr.msk.f32.mxu0 %vm4613_vm4, %v4612_v9 }
0x20d2   :  { %v3562_v34 = vpop.f32.mrb[48].mxu0 }
0x20d3   :  { %v3563_v35 = vadd.f32 %v3927_v33, %v3562_v34  ;;  %v4288_v36 = vpop.f32.mrb[49].mxu0 }
0x20d4   :  { %v3565_v37 = vpop.f32.mrb[50].mxu0  ;;  %v3941_v36 = vld [vmem:[#allocation7 + $0x1] ss:$0 sm:$0xff] }
0x20d5   :  { %v3571_v38 = vmul.f32 0.044715, %v3563_v35  ;;  %v3566_v39 = vadd.f32 %v3927_v33, %v3565_v37  ;;  %v4289_v29 = vpop.f32.mrb[51].mxu0  ;;  %v3569_v54 = vmul.f32 0.5, %v3563_v35 }
0x20d7   :  { %v3573_v31 = vmul.f32 %v3571_v38, %v3563_v35  ;;  %v3572_v40 = vmul.f32 0.044715, %v3566_v39  ;;  %v3570_v44 = vmul.f32 0.5, %v3566_v39 }
0x20d9   :  { %v3575_v41 = vmul.f32 %v3573_v31, %v3563_v35  ;;  %v3574_v42 = vmul.f32 %v3572_v40, %v3566_v39  ;;  %v3942_v31 = vld [vmem:[#allocation8] ss:$0 sm:$0xff] }
0x20db   :  { %v3577_v43 = vadd.f32 %v3575_v41, %v3563_v35  ;;  %v3576_v45 = vmul.f32 %v3574_v42, %v3566_v39 }
0x20dd   :  { %v3579_v47 = vmul.f32 0.7978846, %v3577_v43  ;;  %v3578_v9 = vadd.f32 %v3576_v45, %v3566_v39 }
0x20df   :  { %4479 = vtanh.f32 %v3579_v47  ;;  %v3580_v48 = vmul.f32 0.7978846, %v3578_v9 }
0x20e1   :  { %4481 = vtanh.f32 %v3580_v48 }
0x20e9   :  { %v4480_v49 = vpop.eup %4479 }
0x20ea   :  { %v3583_v50 = vadd.f32 1.0, %v4480_v49  ;;  %v4632_v49 = vmov 3  }
0x20eb   :  { %v4482_v51 = vpop.eup %4481 }
0x20ec   :  { %v3584_v46 = vadd.f32 1.0, %v4482_v51  ;;  %v3585_v56 = vmul.f32 %v3583_v50, %v3569_v54 }
0x20ee   :  { %v3586_v57 = vmul.f32 %v3584_v46, %v3570_v44 }
0x20f0   :  { %v3596_v59 = vpack.c.bf16 %v3586_v57, %v3585_v56 }
0x20f2   :  { %4299 = vmatmul.mubr.msk.bf16.vlgmr.msra.gmra.mrb[44].mxu1 %vm143_vm0, %v3596_v59 }
0x21c5   :  { %v3646_v61 = vpop.f32.mrb[44].mxu1 }
0x21c6   :  { %v3647_v52 = vadd.f32 %v3938_v60, %v3646_v61  ;;  %v4300_v53 = vpop.f32.mrb[45].mxu1 }
0x21c7   :  { %v3649_v62 = vpop.f32.mrb[46].mxu1 }
0x21c8   :  { %v3650_v63 = vadd.f32 %v3938_v60, %v3649_v62  ;;  %v4301_v0 = vpop.f32.mrb[47].mxu1  ;;  %v3653_v55 = vadd.f32 %v3647_v52, %v3507_v18  ;;  %v3708_v18 = vld [vmem:[%s5445_s18 + $0x10] sm:$0xff]  ;;  %s4628_s18 = smov 114  }
0x21c9   :  { %v4333_v25 = vpack.c.bf16 %v3709_v24, %v3708_v18 }
0x21ca   :  { %v3654_v3 = vadd.f32 %v3650_v63, %v3508_v20  ;;  %v3659_v4 = vsel %vm234_vm3, %v3653_v55, 0.0  ;;  %v4627_v20 = vmov 0.0|0.0  }
0x21cb   :  { %3660 = vadd.xlane.f32.xlu1 %v3659_v4  ;;  %4329 = vmatprep.subr.bf16.mxu0 %v4627_v20 }
0x21cc   :  { %v3662_v5 = vsel %vm234_vm3, %v3654_v3, 0.0  ;;  %4331 = vmatpush3.bf16.msra.mxu0 %v4330_v22 }
0x21cd   :  { %3663 = vadd.xlane.f32.xlu0 %v3662_v5  ;;  %4332 = vmatprep.subr.bf16.mxu0 %v4627_v20 }
0x21d0   :  { %4334 = vmatpush3.bf16.msra.mxu0 %v4333_v25 }
0x2258   :  { %v3661_v7 = vpop.xlane.xlu1 %3660 }
0x2259   :  { %v3665_v8 = vmul.f32 0.03125, %v3661_v7 }
0x225a   :  { %v3664_v10 = vpop.xlane.xlu0 %3663 }
0x225b   :  { %v3667_v12 = vsub.f32 %v3653_v55, %v3665_v8  ;;  %v3666_v13 = vmul.f32 0.03125, %v3664_v10 }
0x225d   :  { %v3668_v1 = vsub.f32 %v3654_v3, %v3666_v13  ;;  %v3669_v2 = vmul.f32 %v3667_v12, %v3667_v12 }
0x225f   :  { %v3671_v58 = vsel %vm234_vm3, %v3669_v2, 0.0  ;;  %v3670_v14 = vmul.f32 %v3668_v1, %v3668_v1 }
0x2260   :  { %3672 = vadd.xlane.f32.xlu1 %v3671_v58 }
0x2261   :  { %v3674_v15 = vsel %vm234_vm3, %v3670_v14, 0.0 }
0x2262   :  { %3675 = vadd.xlane.f32.xlu0 %v3674_v15 }
0x22ed   :  { %v3673_v11 = vpop.xlane.xlu1 %3672 }
0x22ee   :  { %v3677_v6 = vmul.f32 0.03125, %v3673_v11 }
0x22ef   :  { %v3676_v26 = vpop.xlane.xlu0 %3675 }
0x22f0   :  { %v3679_v19 = vadd.f32 1e-12, %v3677_v6  ;;  %v3678_v21 = vmul.f32 0.03125, %v3676_v26 }
0x22f2   :  { %4483 = vrsqrt.f32 %v3679_v19  ;;  %v3680_v23 = vadd.f32 1e-12, %v3678_v21 }
0x22f4   :  { %4485 = vrsqrt.f32 %v3680_v23 }
0x22fc   :  { %v4484_v27 = vpop.eup %4483 }
0x22fd   :  { %v3683_v28 = vmul.f32 %v4484_v27, %v3667_v12 }
0x22fe   :  { %v4486_v30 = vpop.eup %4485 }
0x22ff   :  { %v3684_v33 = vmul.f32 %v4486_v30, %v3668_v1  ;;  %v3691_v34 = vmul.f32 %v3940_v32, %v3683_v28 }
0x2301   :  { %v3692_v35 = vmul.f32 %v3940_v32, %v3684_v33  ;;  %v3699_v38 = vadd.f32 %v3941_v36, %v3691_v34 }
0x2303   :  { %v3700_v37 = vadd.f32 %v3941_v36, %v3692_v35 }
0x2305   :  { %v3702_v39 = vrot.slane %v3700_v37, 7 }
0x2307   :  { %v3705_v29 = vsel %vm3704_vm8, %v3699_v38, %v3702_v39 }
0x2308   :  { %4311 = vmatmul.mubr.msk.f32.vlgmr.msra.gmra.mrb[46].mxu0 %vm234_vm3, %v3705_v29 }
0x23db   :  { %v3786_v40 = vpop.f32.mrb[46].mxu0 }
0x23dc   :  { %v3787_v41 = vadd.f32 %v3942_v31, %v3786_v40  ;;  %v4312_v42 = vpop.f32.mrb[47].mxu0 }
0x23de   :  { %3791 = vrot.lane.b32.xlu0 %v3787_v41, %s4628_s18 }
0x2450   :  { %v3792_v43 = vpop.permute.xlu0 %3791 }
0x2451   :  { %v3794_v45 = vmax.f32 %v3787_v41, %v3792_v43 }
0x2453   :  { %3796 = vrot.lane.b32.xlu1 %v3794_v45, %s4629_s12 }
0x24c5   :  { %v3797_v47 = vpop.permute.xlu1 %3796 }
0x24c6   :  { %v3799_v9 = vmax.f32 %v3794_v45, %v3797_v47 }
0x24c8   :  { %3802 = vrot.lane.b32.xlu0 %v3799_v9, %s4630_s27  ;;  %3806 = vrot.lane.b32.xlu1 %v3799_v9, %s4631_s7  ;;  %vm3800_vm12 = vcmp.eq.f32.partialorder %v3787_v41, %v3799_v9 }
0x253a   :  { %v3807_v48 = vpop.permute.xlu1 %3806  ;;  %v3803_v51 = vpop.permute.xlu0 %3802 }
0x253b   :  { %vm3809_vm9 = vcmp.eq.f32.partialorder %v3787_v41, %v3807_v48  ;;  %vm3805_vm10 = vcmp.eq.f32.partialorder %v3787_v41, %v3803_v51 }
0x253c   :  { %v3810_v50 = vsel %vm3809_vm9, 2, %v4632_v49 }
0x253d   :  { %3811 = vrot.lane.b32.xlu1 %v3810_v50, %s4628_s18 }
0x25af   :  { %v3812_v54 = vpop.permute.xlu1 %3811 }
0x25b0   :  { %v3813_v44 = vsel %vm3805_vm10, 1, %v3812_v54 }
0x25b1   :  { %3814 = vrot.lane.b32.xlu0 %v3813_v44, %s4628_s18 }
0x2623   :  { %v3815_v46 = vpop.permute.xlu0 %3814 }
0x2624   :  { %v3816_v56 = vsel %vm3800_vm12, 0, %v3815_v46 }
0x2625   :  { %v3818_v57 = vsel %vm3817_vm11, %v3816_v56, 0 }
0x2626   :  { %3820 = vst.msk [vmem:[#allocation10] sm:$0x3] %vm3819_vm13, %v3818_v57 }
0x2627   :  { %4586 = shalt.err (!%p4583_p8)
}
0x2628   :  { %s5468_s11 = sld [smem:[#allocation20_spill]] }
0x262e   :  { %s4587_s30 = scalar_lea.hbm %s5468_s11, 32 }
0x262f   :  { %p4588_p9 = scmp.ne.s32.totalorder %s5468_s11, %s4587_s30  ;;  %p4591_p10 = scmp.lt.u32.totalorder %s4587_s30, %s5468_s11 }
0x2631   :  { %p4593_p11 = pnand %p4591_p10, %p4588_p9 }
0x2633   :  { %4596 = shalt.err (!%p4593_p11)
}
0x2634   :  { %3830 = dma.vmem_to_hbm [thread:$0]  %s3828_s10, 32, %s5468_s11, [#allocation4]  }
0x2635   :  { %4603 = dma.done.wait [#allocation4], 32  }
0x2636   :  { %4604 = vsyncadd [#allocation4], 4294967264 }
0x2637   :  { %3834 = vsyncpa [#allocation3], 1 }
0x2638   :  { %3835 = vsyncpa [#allocation6], 1 }
0x2639   :  { %3836 = vsyncpa [#allocation9], 1 }
0x263a   :  { %3837 = vsyncpa [#allocation4], 1 }

</bundles_post_ra>
